<compile_context>
chip_gen: v7x
topology: tpu7x:2x2x1
jax: 0.10.0
libtpu: 0.0.40
codegen_flags: <defaults>
</compile_context>

<pallas_src>
import functools

import jax
import jax.numpy as jnp
from jax.experimental import pallas as pl
from jax.experimental.pallas import tpu as pltpu


def qouter_kernel(r_ref, i_ref, out_r_ref, out_i_ref, *, d):
    # r_ref / i_ref blocks: (TR, D); out_*_ref blocks: (TR, D*D) lane-dense.
    r = r_ref[...]
    im = i_ref[...]
    # Unrolled static loop over the outer-product row index `a`.  Each
    # iteration writes one D-wide slab for all TR rows at once:
    #   rho_real[:, a, c] = r[:, a] * r[:, c] + i[:, a] * i[:, c]
    #   rho_imag[:, a, c] = i[:, a] * r[:, c] - r[:, a] * i[:, c]
    # Only (TR, D) temporaries are ever live (no (TR, D, D) intermediates),
    # so there is no spill pressure.  Individual stores are D lanes wide
    # (masked when D < 128), but the output *block* is D*D-lane dense, so the
    # VMEM->HBM writeback — the binding resource — runs at full burst width.
    for a in range(d):
        ra = r[:, a:a + 1]      # (TR, 1), broadcast over lanes below
        ia = im[:, a:a + 1]
        out_r_ref[:, a * d:(a + 1) * d] = ra * r + ia * im
        out_i_ref[:, a * d:(a + 1) * d] = ia * r - ra * im


def _rows_per_block(n_rows, d, itemsize):
    """Pick how many (t, b) rows to process per grid step.

    VMEM use is dominated by the two (TR, D*D) output blocks, each
    double-buffered by the pipeline: 2 outputs * 2 buffers * TR * D*D * bytes.
    Budget ~24 MiB for them so the tile also fits v7x's 64 MiB VMEM
    (v5e / v6e have 128 MiB and simply get extra headroom).
    """
    budget = 24 * 1024 * 1024
    cap = budget // (4 * d * d * itemsize)
    cap = max(8, (cap // 8) * 8)
    tr = min(n_rows, cap)
    # Keep at least 2 grid steps so the "parallel" axis can shard across
    # v7x's two TensorCores and the pipeline has prefetch/writeback overlap.
    if tr == n_rows and n_rows >= 16:
        tr = max(8, ((n_rows + 1) // 2 // 8) * 8)
    if tr >= 8:
        tr -= tr % 8
    return max(1, tr)


def qouter(x, as_list=False):
    """x: list of 2 arrays [real, imag], each of shape [B, T, D].

    Returns (rho_real, rho_imag), each of shape (T, B, D, D) — the stacked
    equivalent of the PyTorch module's per-t list.  Pass as_list=True to get
    the exact list-of-[real, imag] structure (slices stay lazy until used).
    """
    if not isinstance(x, (list, tuple)):
        raise ValueError('x should be called on a list of 2 inputs.')
    if len(x) != 2:
        raise ValueError('x should be called on a list of 2 inputs. Got '
                         + str(len(x)) + ' inputs.')
    real, imag = x
    B, T, D = real.shape
    n_rows = T * B

    # Seq-major rows (t, b) -> row t*B + b.  The input transpose is one extra
    # HBM pass over the *inputs*, which are D x smaller than the outputs.
    r_rows = jnp.transpose(real, (1, 0, 2)).reshape(n_rows, D)
    i_rows = jnp.transpose(imag, (1, 0, 2)).reshape(n_rows, D)

    tr = _rows_per_block(n_rows, D, jnp.dtype(real.dtype).itemsize)
    grid = (pl.cdiv(n_rows, tr),)

    kernel = functools.partial(qouter_kernel, d=D)

    out_r, out_i = pl.pallas_call(
        kernel,
        out_shape=(
            jax.ShapeDtypeStruct((n_rows, D * D), real.dtype),
            jax.ShapeDtypeStruct((n_rows, D * D), real.dtype),
        ),
        grid_spec=pltpu.PrefetchScalarGridSpec(
            num_scalar_prefetch=0,
            grid=grid,
            in_specs=[
                pl.BlockSpec((tr, D), lambda i: (i, 0)),
                pl.BlockSpec((tr, D), lambda i: (i, 0)),
            ],
            out_specs=(
                pl.BlockSpec((tr, D * D), lambda i: (i, 0)),
                pl.BlockSpec((tr, D * D), lambda i: (i, 0)),
            ),
        ),
        compiler_params=pltpu.CompilerParams(
            dimension_semantics=("parallel",),
            vmem_limit_bytes=48 * 1024 * 1024,
        ),
    )(r_rows, i_rows)

    # Free row-major split reshapes: (T*B, D*D) -> (T, B, D, D).
    out_r = out_r.reshape(T, B, D, D)
    out_i = out_i.reshape(T, B, D, D)

    if as_list:
        # Exact structural match of the PyTorch module's output (glue only;
        # slices are not materialized until the consumer uses them).
        return [[out_r[t], out_i[t]] for t in range(T)]
    return out_r, out_i


def qouter_ref(x):
    """Pure-JAX reference (vectorized) mirroring the PyTorch loops."""
    real, imag = x
    r = jnp.transpose(real, (1, 0, 2))    # (T, B, D)
    im = jnp.transpose(imag, (1, 0, 2))
    rho_r = (jnp.einsum('tba,tbc->tbac', r, r)
             + jnp.einsum('tba,tbc->tbac', im, im))
    rho_i = (jnp.einsum('tba,tbc->tbac', im, r)
             - jnp.einsum('tba,tbc->tbac', r, im))
    return rho_r, rho_i


if __name__ == "__main__":
    B, T, D = 2, 8, 32
    key = jax.random.PRNGKey(0)
    k_r, k_i = jax.random.split(key)
    real = jax.random.normal(k_r, (B, T, D), dtype=jnp.float32)
    imag = jax.random.normal(k_i, (B, T, D), dtype=jnp.float32)

    out_r, out_i = qouter([real, imag])
    jax.block_until_ready((out_r, out_i))

    ref_r, ref_i = qouter_ref([real, imag])
    assert out_r.shape == (T, B, D, D) and out_i.shape == (T, B, D, D)
    assert jnp.allclose(out_r, ref_r, atol=1e-5, rtol=1e-5)
    assert jnp.allclose(out_i, ref_i, atol=1e-5, rtol=1e-5)

    # Spot-check the module-shaped list output path as well.
    out_list = qouter([real, imag], as_list=True)
    assert len(out_list) == T
    assert out_list[0][0].shape == (B, D, D)
    assert jnp.allclose(out_list[3][0], ref_r[3], atol=1e-5, rtol=1e-5)
    assert jnp.allclose(out_list[3][1], ref_i[3], atol=1e-5, rtol=1e-5)

    print("KERNEL_OK")
</pallas_src>

<mosaic_0001>
module attributes {stable_mosaic.version = 11 : i64} {
  func.func @qouter_kernel(%arg0: i32, %arg1: memref<8x32xf32, #tpu.memory_space<vmem>>, %arg2: memref<8x32xf32, #tpu.memory_space<vmem>>, %arg3: memref<8x1024xf32, #tpu.memory_space<vmem>>, %arg4: memref<8x1024xf32, #tpu.memory_space<vmem>>) attributes {dimension_semantics = [#tpu.dimension_semantics<parallel>], iteration_bounds = array<i64: 2>, scalar_prefetch = 0 : i64, scratch_operands = 0 : i64, tpu.core_type = #tpu.core_type<tc>, window_params = [{transform_indices = @transform_0, window_bounds = array<i64: 8, 32>}, {transform_indices = @transform_1, window_bounds = array<i64: 8, 32>}, {transform_indices = @transform_2, window_bounds = array<i64: 8, 1024>}, {transform_indices = @transform_3, window_bounds = array<i64: 8, 1024>}]} {
    %c0 = arith.constant 0 : index
    %c0_0 = arith.constant 0 : index
    %0 = vector.load %arg1[%c0, %c0_0] : memref<8x32xf32, #tpu.memory_space<vmem>>, vector<8x32xf32>
    %c0_1 = arith.constant 0 : index
    %c0_2 = arith.constant 0 : index
    %1 = vector.load %arg2[%c0_1, %c0_2] : memref<8x32xf32, #tpu.memory_space<vmem>>, vector<8x32xf32>
    %2 = vector.extract_strided_slice %0 {offsets = [0, 0], sizes = [8, 1], strides = [1, 1]} : vector<8x32xf32> to vector<8x1xf32>
    %3 = vector.extract_strided_slice %1 {offsets = [0, 0], sizes = [8, 1], strides = [1, 1]} : vector<8x32xf32> to vector<8x1xf32>
    %4 = vector.broadcast %2 : vector<8x1xf32> to vector<8x32xf32>
    %5 = arith.mulf %4, %0 : vector<8x32xf32>
    %6 = vector.broadcast %3 : vector<8x1xf32> to vector<8x32xf32>
    %7 = arith.mulf %6, %1 : vector<8x32xf32>
    %8 = arith.addf %5, %7 : vector<8x32xf32>
    %c0_3 = arith.constant 0 : index
    %c0_4 = arith.constant 0 : index
    %9 = vector.load %arg3[%c0_3, %c0_4] : memref<8x1024xf32, #tpu.memory_space<vmem>>, vector<8x32xf32>
    tpu.vector_store %arg3[%c0_3, %c0_4], %8 {strides = array<i32>} : memref<8x1024xf32, #tpu.memory_space<vmem>>, vector<8x32xf32>,
    %10 = vector.broadcast %3 : vector<8x1xf32> to vector<8x32xf32>
    %11 = arith.mulf %10, %0 : vector<8x32xf32>
    %12 = vector.broadcast %2 : vector<8x1xf32> to vector<8x32xf32>
    %13 = arith.mulf %12, %1 : vector<8x32xf32>
    %14 = arith.subf %11, %13 : vector<8x32xf32>
    %c0_5 = arith.constant 0 : index
    %c0_6 = arith.constant 0 : index
    %15 = vector.load %arg4[%c0_5, %c0_6] : memref<8x1024xf32, #tpu.memory_space<vmem>>, vector<8x32xf32>
    tpu.vector_store %arg4[%c0_5, %c0_6], %14 {strides = array<i32>} : memref<8x1024xf32, #tpu.memory_space<vmem>>, vector<8x32xf32>,
    %16 = vector.extract_strided_slice %0 {offsets = [0, 1], sizes = [8, 1], strides = [1, 1]} : vector<8x32xf32> to vector<8x1xf32>
    %17 = vector.extract_strided_slice %1 {offsets = [0, 1], sizes = [8, 1], strides = [1, 1]} : vector<8x32xf32> to vector<8x1xf32>
    %18 = vector.broadcast %16 : vector<8x1xf32> to vector<8x32xf32>
    %19 = arith.mulf %18, %0 : vector<8x32xf32>
    %20 = vector.broadcast %17 : vector<8x1xf32> to vector<8x32xf32>
    %21 = arith.mulf %20, %1 : vector<8x32xf32>
    %22 = arith.addf %19, %21 : vector<8x32xf32>
    %c0_7 = arith.constant 0 : index
    %c32 = arith.constant 32 : index
    %23 = vector.load %arg3[%c0_7, %c32] : memref<8x1024xf32, #tpu.memory_space<vmem>>, vector<8x32xf32>
    tpu.vector_store %arg3[%c0_7, %c32], %22 {strides = array<i32>} : memref<8x1024xf32, #tpu.memory_space<vmem>>, vector<8x32xf32>,
    %24 = vector.broadcast %17 : vector<8x1xf32> to vector<8x32xf32>
    %25 = arith.mulf %24, %0 : vector<8x32xf32>
    %26 = vector.broadcast %16 : vector<8x1xf32> to vector<8x32xf32>
    %27 = arith.mulf %26, %1 : vector<8x32xf32>
    %28 = arith.subf %25, %27 : vector<8x32xf32>
    %c0_8 = arith.constant 0 : index
    %c32_9 = arith.constant 32 : index
    %29 = vector.load %arg4[%c0_8, %c32_9] : memref<8x1024xf32, #tpu.memory_space<vmem>>, vector<8x32xf32>
    tpu.vector_store %arg4[%c0_8, %c32_9], %28 {strides = array<i32>} : memref<8x1024xf32, #tpu.memory_space<vmem>>, vector<8x32xf32>,
    %30 = vector.extract_strided_slice %0 {offsets = [0, 2], sizes = [8, 1], strides = [1, 1]} : vector<8x32xf32> to vector<8x1xf32>
    %31 = vector.extract_strided_slice %1 {offsets = [0, 2], sizes = [8, 1], strides = [1, 1]} : vector<8x32xf32> to vector<8x1xf32>
    %32 = vector.broadcast %30 : vector<8x1xf32> to vector<8x32xf32>
    %33 = arith.mulf %32, %0 : vector<8x32xf32>
    %34 = vector.broadcast %31 : vector<8x1xf32> to vector<8x32xf32>
    %35 = arith.mulf %34, %1 : vector<8x32xf32>
    %36 = arith.addf %33, %35 : vector<8x32xf32>
    %c0_10 = arith.constant 0 : index
    %c64 = arith.constant 64 : index
    %37 = vector.load %arg3[%c0_10, %c64] : memref<8x1024xf32, #tpu.memory_space<vmem>>, vector<8x32xf32>
    tpu.vector_store %arg3[%c0_10, %c64], %36 {strides = array<i32>} : memref<8x1024xf32, #tpu.memory_space<vmem>>, vector<8x32xf32>,
    %38 = vector.broadcast %31 : vector<8x1xf32> to vector<8x32xf32>
    %39 = arith.mulf %38, %0 : vector<8x32xf32>
    %40 = vector.broadcast %30 : vector<8x1xf32> to vector<8x32xf32>
    %41 = arith.mulf %40, %1 : vector<8x32xf32>
    %42 = arith.subf %39, %41 : vector<8x32xf32>
    %c0_11 = arith.constant 0 : index
    %c64_12 = arith.constant 64 : index
    %43 = vector.load %arg4[%c0_11, %c64_12] : memref<8x1024xf32, #tpu.memory_space<vmem>>, vector<8x32xf32>
    tpu.vector_store %arg4[%c0_11, %c64_12], %42 {strides = array<i32>} : memref<8x1024xf32, #tpu.memory_space<vmem>>, vector<8x32xf32>,
    %44 = vector.extract_strided_slice %0 {offsets = [0, 3], sizes = [8, 1], strides = [1, 1]} : vector<8x32xf32> to vector<8x1xf32>
    %45 = vector.extract_strided_slice %1 {offsets = [0, 3], sizes = [8, 1], strides = [1, 1]} : vector<8x32xf32> to vector<8x1xf32>
    %46 = vector.broadcast %44 : vector<8x1xf32> to vector<8x32xf32>
    %47 = arith.mulf %46, %0 : vector<8x32xf32>
    %48 = vector.broadcast %45 : vector<8x1xf32> to vector<8x32xf32>
    %49 = arith.mulf %48, %1 : vector<8x32xf32>
    %50 = arith.addf %47, %49 : vector<8x32xf32>
    %c0_13 = arith.constant 0 : index
    %c96 = arith.constant 96 : index
    %51 = vector.load %arg3[%c0_13, %c96] : memref<8x1024xf32, #tpu.memory_space<vmem>>, vector<8x32xf32>
    tpu.vector_store %arg3[%c0_13, %c96], %50 {strides = array<i32>} : memref<8x1024xf32, #tpu.memory_space<vmem>>, vector<8x32xf32>,
    %52 = vector.broadcast %45 : vector<8x1xf32> to vector<8x32xf32>
    %53 = arith.mulf %52, %0 : vector<8x32xf32>
    %54 = vector.broadcast %44 : vector<8x1xf32> to vector<8x32xf32>
    %55 = arith.mulf %54, %1 : vector<8x32xf32>
    %56 = arith.subf %53, %55 : vector<8x32xf32>
    %c0_14 = arith.constant 0 : index
    %c96_15 = arith.constant 96 : index
    %57 = vector.load %arg4[%c0_14, %c96_15] : memref<8x1024xf32, #tpu.memory_space<vmem>>, vector<8x32xf32>
    tpu.vector_store %arg4[%c0_14, %c96_15], %56 {strides = array<i32>} : memref<8x1024xf32, #tpu.memory_space<vmem>>, vector<8x32xf32>,
    %58 = vector.extract_strided_slice %0 {offsets = [0, 4], sizes = [8, 1], strides = [1, 1]} : vector<8x32xf32> to vector<8x1xf32>
    %59 = vector.extract_strided_slice %1 {offsets = [0, 4], sizes = [8, 1], strides = [1, 1]} : vector<8x32xf32> to vector<8x1xf32>
    %60 = vector.broadcast %58 : vector<8x1xf32> to vector<8x32xf32>
    %61 = arith.mulf %60, %0 : vector<8x32xf32>
    %62 = vector.broadcast %59 : vector<8x1xf32> to vector<8x32xf32>
    %63 = arith.mulf %62, %1 : vector<8x32xf32>
    %64 = arith.addf %61, %63 : vector<8x32xf32>
    %c0_16 = arith.constant 0 : index
    %c128 = arith.constant 128 : index
    %65 = vector.load %arg3[%c0_16, %c128] : memref<8x1024xf32, #tpu.memory_space<vmem>>, vector<8x32xf32>
    tpu.vector_store %arg3[%c0_16, %c128], %64 {strides = array<i32>} : memref<8x1024xf32, #tpu.memory_space<vmem>>, vector<8x32xf32>,
    %66 = vector.broadcast %59 : vector<8x1xf32> to vector<8x32xf32>
    %67 = arith.mulf %66, %0 : vector<8x32xf32>
    %68 = vector.broadcast %58 : vector<8x1xf32> to vector<8x32xf32>
    %69 = arith.mulf %68, %1 : vector<8x32xf32>
    %70 = arith.subf %67, %69 : vector<8x32xf32>
    %c0_17 = arith.constant 0 : index
    %c128_18 = arith.constant 128 : index
    %71 = vector.load %arg4[%c0_17, %c128_18] : memref<8x1024xf32, #tpu.memory_space<vmem>>, vector<8x32xf32>
    tpu.vector_store %arg4[%c0_17, %c128_18], %70 {strides = array<i32>} : memref<8x1024xf32, #tpu.memory_space<vmem>>, vector<8x32xf32>,
    %72 = vector.extract_strided_slice %0 {offsets = [0, 5], sizes = [8, 1], strides = [1, 1]} : vector<8x32xf32> to vector<8x1xf32>
    %73 = vector.extract_strided_slice %1 {offsets = [0, 5], sizes = [8, 1], strides = [1, 1]} : vector<8x32xf32> to vector<8x1xf32>
    %74 = vector.broadcast %72 : vector<8x1xf32> to vector<8x32xf32>
    %75 = arith.mulf %74, %0 : vector<8x32xf32>
    %76 = vector.broadcast %73 : vector<8x1xf32> to vector<8x32xf32>
    %77 = arith.mulf %76, %1 : vector<8x32xf32>
    %78 = arith.addf %75, %77 : vector<8x32xf32>
    %c0_19 = arith.constant 0 : index
    %c160 = arith.constant 160 : index
    %79 = vector.load %arg3[%c0_19, %c160] : memref<8x1024xf32, #tpu.memory_space<vmem>>, vector<8x32xf32>
    tpu.vector_store %arg3[%c0_19, %c160], %78 {strides = array<i32>} : memref<8x1024xf32, #tpu.memory_space<vmem>>, vector<8x32xf32>,
    %80 = vector.broadcast %73 : vector<8x1xf32> to vector<8x32xf32>
    %81 = arith.mulf %80, %0 : vector<8x32xf32>
    %82 = vector.broadcast %72 : vector<8x1xf32> to vector<8x32xf32>
    %83 = arith.mulf %82, %1 : vector<8x32xf32>
    %84 = arith.subf %81, %83 : vector<8x32xf32>
    %c0_20 = arith.constant 0 : index
    %c160_21 = arith.constant 160 : index
    %85 = vector.load %arg4[%c0_20, %c160_21] : memref<8x1024xf32, #tpu.memory_space<vmem>>, vector<8x32xf32>
    tpu.vector_store %arg4[%c0_20, %c160_21], %84 {strides = array<i32>} : memref<8x1024xf32, #tpu.memory_space<vmem>>, vector<8x32xf32>,
    %86 = vector.extract_strided_slice %0 {offsets = [0, 6], sizes = [8, 1], strides = [1, 1]} : vector<8x32xf32> to vector<8x1xf32>
    %87 = vector.extract_strided_slice %1 {offsets = [0, 6], sizes = [8, 1], strides = [1, 1]} : vector<8x32xf32> to vector<8x1xf32>
    %88 = vector.broadcast %86 : vector<8x1xf32> to vector<8x32xf32>
    %89 = arith.mulf %88, %0 : vector<8x32xf32>
    %90 = vector.broadcast %87 : vector<8x1xf32> to vector<8x32xf32>
    %91 = arith.mulf %90, %1 : vector<8x32xf32>
    %92 = arith.addf %89, %91 : vector<8x32xf32>
    %c0_22 = arith.constant 0 : index
    %c192 = arith.constant 192 : index
    %93 = vector.load %arg3[%c0_22, %c192] : memref<8x1024xf32, #tpu.memory_space<vmem>>, vector<8x32xf32>
    tpu.vector_store %arg3[%c0_22, %c192], %92 {strides = array<i32>} : memref<8x1024xf32, #tpu.memory_space<vmem>>, vector<8x32xf32>,
    %94 = vector.broadcast %87 : vector<8x1xf32> to vector<8x32xf32>
    %95 = arith.mulf %94, %0 : vector<8x32xf32>
    %96 = vector.broadcast %86 : vector<8x1xf32> to vector<8x32xf32>
    %97 = arith.mulf %96, %1 : vector<8x32xf32>
    %98 = arith.subf %95, %97 : vector<8x32xf32>
    %c0_23 = arith.constant 0 : index
    %c192_24 = arith.constant 192 : index
    %99 = vector.load %arg4[%c0_23, %c192_24] : memref<8x1024xf32, #tpu.memory_space<vmem>>, vector<8x32xf32>
    tpu.vector_store %arg4[%c0_23, %c192_24], %98 {strides = array<i32>} : memref<8x1024xf32, #tpu.memory_space<vmem>>, vector<8x32xf32>,
    %100 = vector.extract_strided_slice %0 {offsets = [0, 7], sizes = [8, 1], strides = [1, 1]} : vector<8x32xf32> to vector<8x1xf32>
    %101 = vector.extract_strided_slice %1 {offsets = [0, 7], sizes = [8, 1], strides = [1, 1]} : vector<8x32xf32> to vector<8x1xf32>
    %102 = vector.broadcast %100 : vector<8x1xf32> to vector<8x32xf32>
    %103 = arith.mulf %102, %0 : vector<8x32xf32>
    %104 = vector.broadcast %101 : vector<8x1xf32> to vector<8x32xf32>
    %105 = arith.mulf %104, %1 : vector<8x32xf32>
    %106 = arith.addf %103, %105 : vector<8x32xf32>
    %c0_25 = arith.constant 0 : index
    %c224 = arith.constant 224 : index
    %107 = vector.load %arg3[%c0_25, %c224] : memref<8x1024xf32, #tpu.memory_space<vmem>>, vector<8x32xf32>
    tpu.vector_store %arg3[%c0_25, %c224], %106 {strides = array<i32>} : memref<8x1024xf32, #tpu.memory_space<vmem>>, vector<8x32xf32>,
    %108 = vector.broadcast %101 : vector<8x1xf32> to vector<8x32xf32>
    %109 = arith.mulf %108, %0 : vector<8x32xf32>
    %110 = vector.broadcast %100 : vector<8x1xf32> to vector<8x32xf32>
    %111 = arith.mulf %110, %1 : vector<8x32xf32>
    %112 = arith.subf %109, %111 : vector<8x32xf32>
    %c0_26 = arith.constant 0 : index
    %c224_27 = arith.constant 224 : index
    %113 = vector.load %arg4[%c0_26, %c224_27] : memref<8x1024xf32, #tpu.memory_space<vmem>>, vector<8x32xf32>
    tpu.vector_store %arg4[%c0_26, %c224_27], %112 {strides = array<i32>} : memref<8x1024xf32, #tpu.memory_space<vmem>>, vector<8x32xf32>,
    %114 = vector.extract_strided_slice %0 {offsets = [0, 8], sizes = [8, 1], strides = [1, 1]} : vector<8x32xf32> to vector<8x1xf32>
    %115 = vector.extract_strided_slice %1 {offsets = [0, 8], sizes = [8, 1], strides = [1, 1]} : vector<8x32xf32> to vector<8x1xf32>
    %116 = vector.broadcast %114 : vector<8x1xf32> to vector<8x32xf32>
    %117 = arith.mulf %116, %0 : vector<8x32xf32>
    %118 = vector.broadcast %115 : vector<8x1xf32> to vector<8x32xf32>
    %119 = arith.mulf %118, %1 : vector<8x32xf32>
    %120 = arith.addf %117, %119 : vector<8x32xf32>
    %c0_28 = arith.constant 0 : index
    %c256 = arith.constant 256 : index
    %121 = vector.load %arg3[%c0_28, %c256] : memref<8x1024xf32, #tpu.memory_space<vmem>>, vector<8x32xf32>
    tpu.vector_store %arg3[%c0_28, %c256], %120 {strides = array<i32>} : memref<8x1024xf32, #tpu.memory_space<vmem>>, vector<8x32xf32>,
    %122 = vector.broadcast %115 : vector<8x1xf32> to vector<8x32xf32>
    %123 = arith.mulf %122, %0 : vector<8x32xf32>
    %124 = vector.broadcast %114 : vector<8x1xf32> to vector<8x32xf32>
    %125 = arith.mulf %124, %1 : vector<8x32xf32>
    %126 = arith.subf %123, %125 : vector<8x32xf32>
    %c0_29 = arith.constant 0 : index
    %c256_30 = arith.constant 256 : index
    %127 = vector.load %arg4[%c0_29, %c256_30] : memref<8x1024xf32, #tpu.memory_space<vmem>>, vector<8x32xf32>
    tpu.vector_store %arg4[%c0_29, %c256_30], %126 {strides = array<i32>} : memref<8x1024xf32, #tpu.memory_space<vmem>>, vector<8x32xf32>,
    %128 = vector.extract_strided_slice %0 {offsets = [0, 9], sizes = [8, 1], strides = [1, 1]} : vector<8x32xf32> to vector<8x1xf32>
    %129 = vector.extract_strided_slice %1 {offsets = [0, 9], sizes = [8, 1], strides = [1, 1]} : vector<8x32xf32> to vector<8x1xf32>
    %130 = vector.broadcast %128 : vector<8x1xf32> to vector<8x32xf32>
    %131 = arith.mulf %130, %0 : vector<8x32xf32>
    %132 = vector.broadcast %129 : vector<8x1xf32> to vector<8x32xf32>
    %133 = arith.mulf %132, %1 : vector<8x32xf32>
    %134 = arith.addf %131, %133 : vector<8x32xf32>
    %c0_31 = arith.constant 0 : index
    %c288 = arith.constant 288 : index
    %135 = vector.load %arg3[%c0_31, %c288] : memref<8x1024xf32, #tpu.memory_space<vmem>>, vector<8x32xf32>
    tpu.vector_store %arg3[%c0_31, %c288], %134 {strides = array<i32>} : memref<8x1024xf32, #tpu.memory_space<vmem>>, vector<8x32xf32>,
    %136 = vector.broadcast %129 : vector<8x1xf32> to vector<8x32xf32>
    %137 = arith.mulf %136, %0 : vector<8x32xf32>
    %138 = vector.broadcast %128 : vector<8x1xf32> to vector<8x32xf32>
    %139 = arith.mulf %138, %1 : vector<8x32xf32>
    %140 = arith.subf %137, %139 : vector<8x32xf32>
    %c0_32 = arith.constant 0 : index
    %c288_33 = arith.constant 288 : index
    %141 = vector.load %arg4[%c0_32, %c288_33] : memref<8x1024xf32, #tpu.memory_space<vmem>>, vector<8x32xf32>
    tpu.vector_store %arg4[%c0_32, %c288_33], %140 {strides = array<i32>} : memref<8x1024xf32, #tpu.memory_space<vmem>>, vector<8x32xf32>,
    %142 = vector.extract_strided_slice %0 {offsets = [0, 10], sizes = [8, 1], strides = [1, 1]} : vector<8x32xf32> to vector<8x1xf32>
    %143 = vector.extract_strided_slice %1 {offsets = [0, 10], sizes = [8, 1], strides = [1, 1]} : vector<8x32xf32> to vector<8x1xf32>
    %144 = vector.broadcast %142 : vector<8x1xf32> to vector<8x32xf32>
    %145 = arith.mulf %144, %0 : vector<8x32xf32>
    %146 = vector.broadcast %143 : vector<8x1xf32> to vector<8x32xf32>
    %147 = arith.mulf %146, %1 : vector<8x32xf32>
    %148 = arith.addf %145, %147 : vector<8x32xf32>
    %c0_34 = arith.constant 0 : index
    %c320 = arith.constant 320 : index
    %149 = vector.load %arg3[%c0_34, %c320] : memref<8x1024xf32, #tpu.memory_space<vmem>>, vector<8x32xf32>
    tpu.vector_store %arg3[%c0_34, %c320], %148 {strides = array<i32>} : memref<8x1024xf32, #tpu.memory_space<vmem>>, vector<8x32xf32>,
    %150 = vector.broadcast %143 : vector<8x1xf32> to vector<8x32xf32>
    %151 = arith.mulf %150, %0 : vector<8x32xf32>
    %152 = vector.broadcast %142 : vector<8x1xf32> to vector<8x32xf32>
    %153 = arith.mulf %152, %1 : vector<8x32xf32>
    %154 = arith.subf %151, %153 : vector<8x32xf32>
    %c0_35 = arith.constant 0 : index
    %c320_36 = arith.constant 320 : index
    %155 = vector.load %arg4[%c0_35, %c320_36] : memref<8x1024xf32, #tpu.memory_space<vmem>>, vector<8x32xf32>
    tpu.vector_store %arg4[%c0_35, %c320_36], %154 {strides = array<i32>} : memref<8x1024xf32, #tpu.memory_space<vmem>>, vector<8x32xf32>,
    %156 = vector.extract_strided_slice %0 {offsets = [0, 11], sizes = [8, 1], strides = [1, 1]} : vector<8x32xf32> to vector<8x1xf32>
    %157 = vector.extract_strided_slice %1 {offsets = [0, 11], sizes = [8, 1], strides = [1, 1]} : vector<8x32xf32> to vector<8x1xf32>
    %158 = vector.broadcast %156 : vector<8x1xf32> to vector<8x32xf32>
    %159 = arith.mulf %158, %0 : vector<8x32xf32>
    %160 = vector.broadcast %157 : vector<8x1xf32> to vector<8x32xf32>
    %161 = arith.mulf %160, %1 : vector<8x32xf32>
    %162 = arith.addf %159, %161 : vector<8x32xf32>
    %c0_37 = arith.constant 0 : index
    %c352 = arith.constant 352 : index
    %163 = vector.load %arg3[%c0_37, %c352] : memref<8x1024xf32, #tpu.memory_space<vmem>>, vector<8x32xf32>
    tpu.vector_store %arg3[%c0_37, %c352], %162 {strides = array<i32>} : memref<8x1024xf32, #tpu.memory_space<vmem>>, vector<8x32xf32>,
    %164 = vector.broadcast %157 : vector<8x1xf32> to vector<8x32xf32>
    %165 = arith.mulf %164, %0 : vector<8x32xf32>
    %166 = vector.broadcast %156 : vector<8x1xf32> to vector<8x32xf32>
    %167 = arith.mulf %166, %1 : vector<8x32xf32>
    %168 = arith.subf %165, %167 : vector<8x32xf32>
    %c0_38 = arith.constant 0 : index
    %c352_39 = arith.constant 352 : index
    %169 = vector.load %arg4[%c0_38, %c352_39] : memref<8x1024xf32, #tpu.memory_space<vmem>>, vector<8x32xf32>
    tpu.vector_store %arg4[%c0_38, %c352_39], %168 {strides = array<i32>} : memref<8x1024xf32, #tpu.memory_space<vmem>>, vector<8x32xf32>,
    %170 = vector.extract_strided_slice %0 {offsets = [0, 12], sizes = [8, 1], strides = [1, 1]} : vector<8x32xf32> to vector<8x1xf32>
    %171 = vector.extract_strided_slice %1 {offsets = [0, 12], sizes = [8, 1], strides = [1, 1]} : vector<8x32xf32> to vector<8x1xf32>
    %172 = vector.broadcast %170 : vector<8x1xf32> to vector<8x32xf32>
    %173 = arith.mulf %172, %0 : vector<8x32xf32>
    %174 = vector.broadcast %171 : vector<8x1xf32> to vector<8x32xf32>
    %175 = arith.mulf %174, %1 : vector<8x32xf32>
    %176 = arith.addf %173, %175 : vector<8x32xf32>
    %c0_40 = arith.constant 0 : index
    %c384 = arith.constant 384 : index
    %177 = vector.load %arg3[%c0_40, %c384] : memref<8x1024xf32, #tpu.memory_space<vmem>>, vector<8x32xf32>
    tpu.vector_store %arg3[%c0_40, %c384], %176 {strides = array<i32>} : memref<8x1024xf32, #tpu.memory_space<vmem>>, vector<8x32xf32>,
    %178 = vector.broadcast %171 : vector<8x1xf32> to vector<8x32xf32>
    %179 = arith.mulf %178, %0 : vector<8x32xf32>
    %180 = vector.broadcast %170 : vector<8x1xf32> to vector<8x32xf32>
    %181 = arith.mulf %180, %1 : vector<8x32xf32>
    %182 = arith.subf %179, %181 : vector<8x32xf32>
    %c0_41 = arith.constant 0 : index
    %c384_42 = arith.constant 384 : index
    %183 = vector.load %arg4[%c0_41, %c384_42] : memref<8x1024xf32, #tpu.memory_space<vmem>>, vector<8x32xf32>
    tpu.vector_store %arg4[%c0_41, %c384_42], %182 {strides = array<i32>} : memref<8x1024xf32, #tpu.memory_space<vmem>>, vector<8x32xf32>,
    %184 = vector.extract_strided_slice %0 {offsets = [0, 13], sizes = [8, 1], strides = [1, 1]} : vector<8x32xf32> to vector<8x1xf32>
    %185 = vector.extract_strided_slice %1 {offsets = [0, 13], sizes = [8, 1], strides = [1, 1]} : vector<8x32xf32> to vector<8x1xf32>
    %186 = vector.broadcast %184 : vector<8x1xf32> to vector<8x32xf32>
    %187 = arith.mulf %186, %0 : vector<8x32xf32>
    %188 = vector.broadcast %185 : vector<8x1xf32> to vector<8x32xf32>
    %189 = arith.mulf %188, %1 : vector<8x32xf32>
    %190 = arith.addf %187, %189 : vector<8x32xf32>
    %c0_43 = arith.constant 0 : index
    %c416 = arith.constant 416 : index
    %191 = vector.load %arg3[%c0_43, %c416] : memref<8x1024xf32, #tpu.memory_space<vmem>>, vector<8x32xf32>
    tpu.vector_store %arg3[%c0_43, %c416], %190 {strides = array<i32>} : memref<8x1024xf32, #tpu.memory_space<vmem>>, vector<8x32xf32>,
    %192 = vector.broadcast %185 : vector<8x1xf32> to vector<8x32xf32>
    %193 = arith.mulf %192, %0 : vector<8x32xf32>
    %194 = vector.broadcast %184 : vector<8x1xf32> to vector<8x32xf32>
    %195 = arith.mulf %194, %1 : vector<8x32xf32>
    %196 = arith.subf %193, %195 : vector<8x32xf32>
    %c0_44 = arith.constant 0 : index
    %c416_45 = arith.constant 416 : index
    %197 = vector.load %arg4[%c0_44, %c416_45] : memref<8x1024xf32, #tpu.memory_space<vmem>>, vector<8x32xf32>
    tpu.vector_store %arg4[%c0_44, %c416_45], %196 {strides = array<i32>} : memref<8x1024xf32, #tpu.memory_space<vmem>>, vector<8x32xf32>,
    %198 = vector.extract_strided_slice %0 {offsets = [0, 14], sizes = [8, 1], strides = [1, 1]} : vector<8x32xf32> to vector<8x1xf32>
    %199 = vector.extract_strided_slice %1 {offsets = [0, 14], sizes = [8, 1], strides = [1, 1]} : vector<8x32xf32> to vector<8x1xf32>
    %200 = vector.broadcast %198 : vector<8x1xf32> to vector<8x32xf32>
    %201 = arith.mulf %200, %0 : vector<8x32xf32>
    %202 = vector.broadcast %199 : vector<8x1xf32> to vector<8x32xf32>
    %203 = arith.mulf %202, %1 : vector<8x32xf32>
    %204 = arith.addf %201, %203 : vector<8x32xf32>
    %c0_46 = arith.constant 0 : index
    %c448 = arith.constant 448 : index
    %205 = vector.load %arg3[%c0_46, %c448] : memref<8x1024xf32, #tpu.memory_space<vmem>>, vector<8x32xf32>
    tpu.vector_store %arg3[%c0_46, %c448], %204 {strides = array<i32>} : memref<8x1024xf32, #tpu.memory_space<vmem>>, vector<8x32xf32>,
    %206 = vector.broadcast %199 : vector<8x1xf32> to vector<8x32xf32>
    %207 = arith.mulf %206, %0 : vector<8x32xf32>
    %208 = vector.broadcast %198 : vector<8x1xf32> to vector<8x32xf32>
    %209 = arith.mulf %208, %1 : vector<8x32xf32>
    %210 = arith.subf %207, %209 : vector<8x32xf32>
    %c0_47 = arith.constant 0 : index
    %c448_48 = arith.constant 448 : index
    %211 = vector.load %arg4[%c0_47, %c448_48] : memref<8x1024xf32, #tpu.memory_space<vmem>>, vector<8x32xf32>
    tpu.vector_store %arg4[%c0_47, %c448_48], %210 {strides = array<i32>} : memref<8x1024xf32, #tpu.memory_space<vmem>>, vector<8x32xf32>,
    %212 = vector.extract_strided_slice %0 {offsets = [0, 15], sizes = [8, 1], strides = [1, 1]} : vector<8x32xf32> to vector<8x1xf32>
    %213 = vector.extract_strided_slice %1 {offsets = [0, 15], sizes = [8, 1], strides = [1, 1]} : vector<8x32xf32> to vector<8x1xf32>
    %214 = vector.broadcast %212 : vector<8x1xf32> to vector<8x32xf32>
    %215 = arith.mulf %214, %0 : vector<8x32xf32>
    %216 = vector.broadcast %213 : vector<8x1xf32> to vector<8x32xf32>
    %217 = arith.mulf %216, %1 : vector<8x32xf32>
    %218 = arith.addf %215, %217 : vector<8x32xf32>
    %c0_49 = arith.constant 0 : index
    %c480 = arith.constant 480 : index
    %219 = vector.load %arg3[%c0_49, %c480] : memref<8x1024xf32, #tpu.memory_space<vmem>>, vector<8x32xf32>
    tpu.vector_store %arg3[%c0_49, %c480], %218 {strides = array<i32>} : memref<8x1024xf32, #tpu.memory_space<vmem>>, vector<8x32xf32>,
    %220 = vector.broadcast %213 : vector<8x1xf32> to vector<8x32xf32>
    %221 = arith.mulf %220, %0 : vector<8x32xf32>
    %222 = vector.broadcast %212 : vector<8x1xf32> to vector<8x32xf32>
    %223 = arith.mulf %222, %1 : vector<8x32xf32>
    %224 = arith.subf %221, %223 : vector<8x32xf32>
    %c0_50 = arith.constant 0 : index
    %c480_51 = arith.constant 480 : index
    %225 = vector.load %arg4[%c0_50, %c480_51] : memref<8x1024xf32, #tpu.memory_space<vmem>>, vector<8x32xf32>
    tpu.vector_store %arg4[%c0_50, %c480_51], %224 {strides = array<i32>} : memref<8x1024xf32, #tpu.memory_space<vmem>>, vector<8x32xf32>,
    %226 = vector.extract_strided_slice %0 {offsets = [0, 16], sizes = [8, 1], strides = [1, 1]} : vector<8x32xf32> to vector<8x1xf32>
    %227 = vector.extract_strided_slice %1 {offsets = [0, 16], sizes = [8, 1], strides = [1, 1]} : vector<8x32xf32> to vector<8x1xf32>
    %228 = vector.broadcast %226 : vector<8x1xf32> to vector<8x32xf32>
    %229 = arith.mulf %228, %0 : vector<8x32xf32>
    %230 = vector.broadcast %227 : vector<8x1xf32> to vector<8x32xf32>
    %231 = arith.mulf %230, %1 : vector<8x32xf32>
    %232 = arith.addf %229, %231 : vector<8x32xf32>
    %c0_52 = arith.constant 0 : index
    %c512 = arith.constant 512 : index
    %233 = vector.load %arg3[%c0_52, %c512] : memref<8x1024xf32, #tpu.memory_space<vmem>>, vector<8x32xf32>
    tpu.vector_store %arg3[%c0_52, %c512], %232 {strides = array<i32>} : memref<8x1024xf32, #tpu.memory_space<vmem>>, vector<8x32xf32>,
    %234 = vector.broadcast %227 : vector<8x1xf32> to vector<8x32xf32>
    %235 = arith.mulf %234, %0 : vector<8x32xf32>
    %236 = vector.broadcast %226 : vector<8x1xf32> to vector<8x32xf32>
    %237 = arith.mulf %236, %1 : vector<8x32xf32>
    %238 = arith.subf %235, %237 : vector<8x32xf32>
    %c0_53 = arith.constant 0 : index
    %c512_54 = arith.constant 512 : index
    %239 = vector.load %arg4[%c0_53, %c512_54] : memref<8x1024xf32, #tpu.memory_space<vmem>>, vector<8x32xf32>
    tpu.vector_store %arg4[%c0_53, %c512_54], %238 {strides = array<i32>} : memref<8x1024xf32, #tpu.memory_space<vmem>>, vector<8x32xf32>,
    %240 = vector.extract_strided_slice %0 {offsets = [0, 17], sizes = [8, 1], strides = [1, 1]} : vector<8x32xf32> to vector<8x1xf32>
    %241 = vector.extract_strided_slice %1 {offsets = [0, 17], sizes = [8, 1], strides = [1, 1]} : vector<8x32xf32> to vector<8x1xf32>
    %242 = vector.broadcast %240 : vector<8x1xf32> to vector<8x32xf32>
    %243 = arith.mulf %242, %0 : vector<8x32xf32>
    %244 = vector.broadcast %241 : vector<8x1xf32> to vector<8x32xf32>
    %245 = arith.mulf %244, %1 : vector<8x32xf32>
    %246 = arith.addf %243, %245 : vector<8x32xf32>
    %c0_55 = arith.constant 0 : index
    %c544 = arith.constant 544 : index
    %247 = vector.load %arg3[%c0_55, %c544] : memref<8x1024xf32, #tpu.memory_space<vmem>>, vector<8x32xf32>
    tpu.vector_store %arg3[%c0_55, %c544], %246 {strides = array<i32>} : memref<8x1024xf32, #tpu.memory_space<vmem>>, vector<8x32xf32>,
    %248 = vector.broadcast %241 : vector<8x1xf32> to vector<8x32xf32>
    %249 = arith.mulf %248, %0 : vector<8x32xf32>
    %250 = vector.broadcast %240 : vector<8x1xf32> to vector<8x32xf32>
    %251 = arith.mulf %250, %1 : vector<8x32xf32>
    %252 = arith.subf %249, %251 : vector<8x32xf32>
    %c0_56 = arith.constant 0 : index
    %c544_57 = arith.constant 544 : index
    %253 = vector.load %arg4[%c0_56, %c544_57] : memref<8x1024xf32, #tpu.memory_space<vmem>>, vector<8x32xf32>
    tpu.vector_store %arg4[%c0_56, %c544_57], %252 {strides = array<i32>} : memref<8x1024xf32, #tpu.memory_space<vmem>>, vector<8x32xf32>,
    %254 = vector.extract_strided_slice %0 {offsets = [0, 18], sizes = [8, 1], strides = [1, 1]} : vector<8x32xf32> to vector<8x1xf32>
    %255 = vector.extract_strided_slice %1 {offsets = [0, 18], sizes = [8, 1], strides = [1, 1]} : vector<8x32xf32> to vector<8x1xf32>
    %256 = vector.broadcast %254 : vector<8x1xf32> to vector<8x32xf32>
    %257 = arith.mulf %256, %0 : vector<8x32xf32>
    %258 = vector.broadcast %255 : vector<8x1xf32> to vector<8x32xf32>
    %259 = arith.mulf %258, %1 : vector<8x32xf32>
    %260 = arith.addf %257, %259 : vector<8x32xf32>
    %c0_58 = arith.constant 0 : index
    %c576 = arith.constant 576 : index
    %261 = vector.load %arg3[%c0_58, %c576] : memref<8x1024xf32, #tpu.memory_space<vmem>>, vector<8x32xf32>
    tpu.vector_store %arg3[%c0_58, %c576], %260 {strides = array<i32>} : memref<8x1024xf32, #tpu.memory_space<vmem>>, vector<8x32xf32>,
    %262 = vector.broadcast %255 : vector<8x1xf32> to vector<8x32xf32>
    %263 = arith.mulf %262, %0 : vector<8x32xf32>
    %264 = vector.broadcast %254 : vector<8x1xf32> to vector<8x32xf32>
    %265 = arith.mulf %264, %1 : vector<8x32xf32>
    %266 = arith.subf %263, %265 : vector<8x32xf32>
    %c0_59 = arith.constant 0 : index
    %c576_60 = arith.constant 576 : index
    %267 = vector.load %arg4[%c0_59, %c576_60] : memref<8x1024xf32, #tpu.memory_space<vmem>>, vector<8x32xf32>
    tpu.vector_store %arg4[%c0_59, %c576_60], %266 {strides = array<i32>} : memref<8x1024xf32, #tpu.memory_space<vmem>>, vector<8x32xf32>,
    %268 = vector.extract_strided_slice %0 {offsets = [0, 19], sizes = [8, 1], strides = [1, 1]} : vector<8x32xf32> to vector<8x1xf32>
    %269 = vector.extract_strided_slice %1 {offsets = [0, 19], sizes = [8, 1], strides = [1, 1]} : vector<8x32xf32> to vector<8x1xf32>
    %270 = vector.broadcast %268 : vector<8x1xf32> to vector<8x32xf32>
    %271 = arith.mulf %270, %0 : vector<8x32xf32>
    %272 = vector.broadcast %269 : vector<8x1xf32> to vector<8x32xf32>
    %273 = arith.mulf %272, %1 : vector<8x32xf32>
    %274 = arith.addf %271, %273 : vector<8x32xf32>
    %c0_61 = arith.constant 0 : index
    %c608 = arith.constant 608 : index
    %275 = vector.load %arg3[%c0_61, %c608] : memref<8x1024xf32, #tpu.memory_space<vmem>>, vector<8x32xf32>
    tpu.vector_store %arg3[%c0_61, %c608], %274 {strides = array<i32>} : memref<8x1024xf32, #tpu.memory_space<vmem>>, vector<8x32xf32>,
    %276 = vector.broadcast %269 : vector<8x1xf32> to vector<8x32xf32>
    %277 = arith.mulf %276, %0 : vector<8x32xf32>
    %278 = vector.broadcast %268 : vector<8x1xf32> to vector<8x32xf32>
    %279 = arith.mulf %278, %1 : vector<8x32xf32>
    %280 = arith.subf %277, %279 : vector<8x32xf32>
    %c0_62 = arith.constant 0 : index
    %c608_63 = arith.constant 608 : index
    %281 = vector.load %arg4[%c0_62, %c608_63] : memref<8x1024xf32, #tpu.memory_space<vmem>>, vector<8x32xf32>
    tpu.vector_store %arg4[%c0_62, %c608_63], %280 {strides = array<i32>} : memref<8x1024xf32, #tpu.memory_space<vmem>>, vector<8x32xf32>,
    %282 = vector.extract_strided_slice %0 {offsets = [0, 20], sizes = [8, 1], strides = [1, 1]} : vector<8x32xf32> to vector<8x1xf32>
    %283 = vector.extract_strided_slice %1 {offsets = [0, 20], sizes = [8, 1], strides = [1, 1]} : vector<8x32xf32> to vector<8x1xf32>
    %284 = vector.broadcast %282 : vector<8x1xf32> to vector<8x32xf32>
    %285 = arith.mulf %284, %0 : vector<8x32xf32>
    %286 = vector.broadcast %283 : vector<8x1xf32> to vector<8x32xf32>
    %287 = arith.mulf %286, %1 : vector<8x32xf32>
    %288 = arith.addf %285, %287 : vector<8x32xf32>
    %c0_64 = arith.constant 0 : index
    %c640 = arith.constant 640 : index
    %289 = vector.load %arg3[%c0_64, %c640] : memref<8x1024xf32, #tpu.memory_space<vmem>>, vector<8x32xf32>
    tpu.vector_store %arg3[%c0_64, %c640], %288 {strides = array<i32>} : memref<8x1024xf32, #tpu.memory_space<vmem>>, vector<8x32xf32>,
    %290 = vector.broadcast %283 : vector<8x1xf32> to vector<8x32xf32>
    %291 = arith.mulf %290, %0 : vector<8x32xf32>
    %292 = vector.broadcast %282 : vector<8x1xf32> to vector<8x32xf32>
    %293 = arith.mulf %292, %1 : vector<8x32xf32>
    %294 = arith.subf %291, %293 : vector<8x32xf32>
    %c0_65 = arith.constant 0 : index
    %c640_66 = arith.constant 640 : index
    %295 = vector.load %arg4[%c0_65, %c640_66] : memref<8x1024xf32, #tpu.memory_space<vmem>>, vector<8x32xf32>
    tpu.vector_store %arg4[%c0_65, %c640_66], %294 {strides = array<i32>} : memref<8x1024xf32, #tpu.memory_space<vmem>>, vector<8x32xf32>,
    %296 = vector.extract_strided_slice %0 {offsets = [0, 21], sizes = [8, 1], strides = [1, 1]} : vector<8x32xf32> to vector<8x1xf32>
    %297 = vector.extract_strided_slice %1 {offsets = [0, 21], sizes = [8, 1], strides = [1, 1]} : vector<8x32xf32> to vector<8x1xf32>
    %298 = vector.broadcast %296 : vector<8x1xf32> to vector<8x32xf32>
    %299 = arith.mulf %298, %0 : vector<8x32xf32>
    %300 = vector.broadcast %297 : vector<8x1xf32> to vector<8x32xf32>
    %301 = arith.mulf %300, %1 : vector<8x32xf32>
    %302 = arith.addf %299, %301 : vector<8x32xf32>
    %c0_67 = arith.constant 0 : index
    %c672 = arith.constant 672 : index
    %303 = vector.load %arg3[%c0_67, %c672] : memref<8x1024xf32, #tpu.memory_space<vmem>>, vector<8x32xf32>
    tpu.vector_store %arg3[%c0_67, %c672], %302 {strides = array<i32>} : memref<8x1024xf32, #tpu.memory_space<vmem>>, vector<8x32xf32>,
    %304 = vector.broadcast %297 : vector<8x1xf32> to vector<8x32xf32>
    %305 = arith.mulf %304, %0 : vector<8x32xf32>
    %306 = vector.broadcast %296 : vector<8x1xf32> to vector<8x32xf32>
    %307 = arith.mulf %306, %1 : vector<8x32xf32>
    %308 = arith.subf %305, %307 : vector<8x32xf32>
    %c0_68 = arith.constant 0 : index
    %c672_69 = arith.constant 672 : index
    %309 = vector.load %arg4[%c0_68, %c672_69] : memref<8x1024xf32, #tpu.memory_space<vmem>>, vector<8x32xf32>
    tpu.vector_store %arg4[%c0_68, %c672_69], %308 {strides = array<i32>} : memref<8x1024xf32, #tpu.memory_space<vmem>>, vector<8x32xf32>,
    %310 = vector.extract_strided_slice %0 {offsets = [0, 22], sizes = [8, 1], strides = [1, 1]} : vector<8x32xf32> to vector<8x1xf32>
    %311 = vector.extract_strided_slice %1 {offsets = [0, 22], sizes = [8, 1], strides = [1, 1]} : vector<8x32xf32> to vector<8x1xf32>
    %312 = vector.broadcast %310 : vector<8x1xf32> to vector<8x32xf32>
    %313 = arith.mulf %312, %0 : vector<8x32xf32>
    %314 = vector.broadcast %311 : vector<8x1xf32> to vector<8x32xf32>
    %315 = arith.mulf %314, %1 : vector<8x32xf32>
    %316 = arith.addf %313, %315 : vector<8x32xf32>
    %c0_70 = arith.constant 0 : index
    %c704 = arith.constant 704 : index
    %317 = vector.load %arg3[%c0_70, %c704] : memref<8x1024xf32, #tpu.memory_space<vmem>>, vector<8x32xf32>
    tpu.vector_store %arg3[%c0_70, %c704], %316 {strides = array<i32>} : memref<8x1024xf32, #tpu.memory_space<vmem>>, vector<8x32xf32>,
    %318 = vector.broadcast %311 : vector<8x1xf32> to vector<8x32xf32>
    %319 = arith.mulf %318, %0 : vector<8x32xf32>
    %320 = vector.broadcast %310 : vector<8x1xf32> to vector<8x32xf32>
    %321 = arith.mulf %320, %1 : vector<8x32xf32>
    %322 = arith.subf %319, %321 : vector<8x32xf32>
    %c0_71 = arith.constant 0 : index
    %c704_72 = arith.constant 704 : index
    %323 = vector.load %arg4[%c0_71, %c704_72] : memref<8x1024xf32, #tpu.memory_space<vmem>>, vector<8x32xf32>
    tpu.vector_store %arg4[%c0_71, %c704_72], %322 {strides = array<i32>} : memref<8x1024xf32, #tpu.memory_space<vmem>>, vector<8x32xf32>,
    %324 = vector.extract_strided_slice %0 {offsets = [0, 23], sizes = [8, 1], strides = [1, 1]} : vector<8x32xf32> to vector<8x1xf32>
    %325 = vector.extract_strided_slice %1 {offsets = [0, 23], sizes = [8, 1], strides = [1, 1]} : vector<8x32xf32> to vector<8x1xf32>
    %326 = vector.broadcast %324 : vector<8x1xf32> to vector<8x32xf32>
    %327 = arith.mulf %326, %0 : vector<8x32xf32>
    %328 = vector.broadcast %325 : vector<8x1xf32> to vector<8x32xf32>
    %329 = arith.mulf %328, %1 : vector<8x32xf32>
    %330 = arith.addf %327, %329 : vector<8x32xf32>
    %c0_73 = arith.constant 0 : index
    %c736 = arith.constant 736 : index
    %331 = vector.load %arg3[%c0_73, %c736] : memref<8x1024xf32, #tpu.memory_space<vmem>>, vector<8x32xf32>
    tpu.vector_store %arg3[%c0_73, %c736], %330 {strides = array<i32>} : memref<8x1024xf32, #tpu.memory_space<vmem>>, vector<8x32xf32>,
    %332 = vector.broadcast %325 : vector<8x1xf32> to vector<8x32xf32>
    %333 = arith.mulf %332, %0 : vector<8x32xf32>
    %334 = vector.broadcast %324 : vector<8x1xf32> to vector<8x32xf32>
    %335 = arith.mulf %334, %1 : vector<8x32xf32>
    %336 = arith.subf %333, %335 : vector<8x32xf32>
    %c0_74 = arith.constant 0 : index
    %c736_75 = arith.constant 736 : index
    %337 = vector.load %arg4[%c0_74, %c736_75] : memref<8x1024xf32, #tpu.memory_space<vmem>>, vector<8x32xf32>
    tpu.vector_store %arg4[%c0_74, %c736_75], %336 {strides = array<i32>} : memref<8x1024xf32, #tpu.memory_space<vmem>>, vector<8x32xf32>,
    %338 = vector.extract_strided_slice %0 {offsets = [0, 24], sizes = [8, 1], strides = [1, 1]} : vector<8x32xf32> to vector<8x1xf32>
    %339 = vector.extract_strided_slice %1 {offsets = [0, 24], sizes = [8, 1], strides = [1, 1]} : vector<8x32xf32> to vector<8x1xf32>
    %340 = vector.broadcast %338 : vector<8x1xf32> to vector<8x32xf32>
    %341 = arith.mulf %340, %0 : vector<8x32xf32>
    %342 = vector.broadcast %339 : vector<8x1xf32> to vector<8x32xf32>
    %343 = arith.mulf %342, %1 : vector<8x32xf32>
    %344 = arith.addf %341, %343 : vector<8x32xf32>
    %c0_76 = arith.constant 0 : index
    %c768 = arith.constant 768 : index
    %345 = vector.load %arg3[%c0_76, %c768] : memref<8x1024xf32, #tpu.memory_space<vmem>>, vector<8x32xf32>
    tpu.vector_store %arg3[%c0_76, %c768], %344 {strides = array<i32>} : memref<8x1024xf32, #tpu.memory_space<vmem>>, vector<8x32xf32>,
    %346 = vector.broadcast %339 : vector<8x1xf32> to vector<8x32xf32>
    %347 = arith.mulf %346, %0 : vector<8x32xf32>
    %348 = vector.broadcast %338 : vector<8x1xf32> to vector<8x32xf32>
    %349 = arith.mulf %348, %1 : vector<8x32xf32>
    %350 = arith.subf %347, %349 : vector<8x32xf32>
    %c0_77 = arith.constant 0 : index
    %c768_78 = arith.constant 768 : index
    %351 = vector.load %arg4[%c0_77, %c768_78] : memref<8x1024xf32, #tpu.memory_space<vmem>>, vector<8x32xf32>
    tpu.vector_store %arg4[%c0_77, %c768_78], %350 {strides = array<i32>} : memref<8x1024xf32, #tpu.memory_space<vmem>>, vector<8x32xf32>,
    %352 = vector.extract_strided_slice %0 {offsets = [0, 25], sizes = [8, 1], strides = [1, 1]} : vector<8x32xf32> to vector<8x1xf32>
    %353 = vector.extract_strided_slice %1 {offsets = [0, 25], sizes = [8, 1], strides = [1, 1]} : vector<8x32xf32> to vector<8x1xf32>
    %354 = vector.broadcast %352 : vector<8x1xf32> to vector<8x32xf32>
    %355 = arith.mulf %354, %0 : vector<8x32xf32>
    %356 = vector.broadcast %353 : vector<8x1xf32> to vector<8x32xf32>
    %357 = arith.mulf %356, %1 : vector<8x32xf32>
    %358 = arith.addf %355, %357 : vector<8x32xf32>
    %c0_79 = arith.constant 0 : index
    %c800 = arith.constant 800 : index
    %359 = vector.load %arg3[%c0_79, %c800] : memref<8x1024xf32, #tpu.memory_space<vmem>>, vector<8x32xf32>
    tpu.vector_store %arg3[%c0_79, %c800], %358 {strides = array<i32>} : memref<8x1024xf32, #tpu.memory_space<vmem>>, vector<8x32xf32>,
    %360 = vector.broadcast %353 : vector<8x1xf32> to vector<8x32xf32>
    %361 = arith.mulf %360, %0 : vector<8x32xf32>
    %362 = vector.broadcast %352 : vector<8x1xf32> to vector<8x32xf32>
    %363 = arith.mulf %362, %1 : vector<8x32xf32>
    %364 = arith.subf %361, %363 : vector<8x32xf32>
    %c0_80 = arith.constant 0 : index
    %c800_81 = arith.constant 800 : index
    %365 = vector.load %arg4[%c0_80, %c800_81] : memref<8x1024xf32, #tpu.memory_space<vmem>>, vector<8x32xf32>
    tpu.vector_store %arg4[%c0_80, %c800_81], %364 {strides = array<i32>} : memref<8x1024xf32, #tpu.memory_space<vmem>>, vector<8x32xf32>,
    %366 = vector.extract_strided_slice %0 {offsets = [0, 26], sizes = [8, 1], strides = [1, 1]} : vector<8x32xf32> to vector<8x1xf32>
    %367 = vector.extract_strided_slice %1 {offsets = [0, 26], sizes = [8, 1], strides = [1, 1]} : vector<8x32xf32> to vector<8x1xf32>
    %368 = vector.broadcast %366 : vector<8x1xf32> to vector<8x32xf32>
    %369 = arith.mulf %368, %0 : vector<8x32xf32>
    %370 = vector.broadcast %367 : vector<8x1xf32> to vector<8x32xf32>
    %371 = arith.mulf %370, %1 : vector<8x32xf32>
    %372 = arith.addf %369, %371 : vector<8x32xf32>
    %c0_82 = arith.constant 0 : index
    %c832 = arith.constant 832 : index
    %373 = vector.load %arg3[%c0_82, %c832] : memref<8x1024xf32, #tpu.memory_space<vmem>>, vector<8x32xf32>
    tpu.vector_store %arg3[%c0_82, %c832], %372 {strides = array<i32>} : memref<8x1024xf32, #tpu.memory_space<vmem>>, vector<8x32xf32>,
    %374 = vector.broadcast %367 : vector<8x1xf32> to vector<8x32xf32>
    %375 = arith.mulf %374, %0 : vector<8x32xf32>
    %376 = vector.broadcast %366 : vector<8x1xf32> to vector<8x32xf32>
    %377 = arith.mulf %376, %1 : vector<8x32xf32>
    %378 = arith.subf %375, %377 : vector<8x32xf32>
    %c0_83 = arith.constant 0 : index
    %c832_84 = arith.constant 832 : index
    %379 = vector.load %arg4[%c0_83, %c832_84] : memref<8x1024xf32, #tpu.memory_space<vmem>>, vector<8x32xf32>
    tpu.vector_store %arg4[%c0_83, %c832_84], %378 {strides = array<i32>} : memref<8x1024xf32, #tpu.memory_space<vmem>>, vector<8x32xf32>,
    %380 = vector.extract_strided_slice %0 {offsets = [0, 27], sizes = [8, 1], strides = [1, 1]} : vector<8x32xf32> to vector<8x1xf32>
    %381 = vector.extract_strided_slice %1 {offsets = [0, 27], sizes = [8, 1], strides = [1, 1]} : vector<8x32xf32> to vector<8x1xf32>
    %382 = vector.broadcast %380 : vector<8x1xf32> to vector<8x32xf32>
    %383 = arith.mulf %382, %0 : vector<8x32xf32>
    %384 = vector.broadcast %381 : vector<8x1xf32> to vector<8x32xf32>
    %385 = arith.mulf %384, %1 : vector<8x32xf32>
    %386 = arith.addf %383, %385 : vector<8x32xf32>
    %c0_85 = arith.constant 0 : index
    %c864 = arith.constant 864 : index
    %387 = vector.load %arg3[%c0_85, %c864] : memref<8x1024xf32, #tpu.memory_space<vmem>>, vector<8x32xf32>
    tpu.vector_store %arg3[%c0_85, %c864], %386 {strides = array<i32>} : memref<8x1024xf32, #tpu.memory_space<vmem>>, vector<8x32xf32>,
    %388 = vector.broadcast %381 : vector<8x1xf32> to vector<8x32xf32>
    %389 = arith.mulf %388, %0 : vector<8x32xf32>
    %390 = vector.broadcast %380 : vector<8x1xf32> to vector<8x32xf32>
    %391 = arith.mulf %390, %1 : vector<8x32xf32>
    %392 = arith.subf %389, %391 : vector<8x32xf32>
    %c0_86 = arith.constant 0 : index
    %c864_87 = arith.constant 864 : index
    %393 = vector.load %arg4[%c0_86, %c864_87] : memref<8x1024xf32, #tpu.memory_space<vmem>>, vector<8x32xf32>
    tpu.vector_store %arg4[%c0_86, %c864_87], %392 {strides = array<i32>} : memref<8x1024xf32, #tpu.memory_space<vmem>>, vector<8x32xf32>,
    %394 = vector.extract_strided_slice %0 {offsets = [0, 28], sizes = [8, 1], strides = [1, 1]} : vector<8x32xf32> to vector<8x1xf32>
    %395 = vector.extract_strided_slice %1 {offsets = [0, 28], sizes = [8, 1], strides = [1, 1]} : vector<8x32xf32> to vector<8x1xf32>
    %396 = vector.broadcast %394 : vector<8x1xf32> to vector<8x32xf32>
    %397 = arith.mulf %396, %0 : vector<8x32xf32>
    %398 = vector.broadcast %395 : vector<8x1xf32> to vector<8x32xf32>
    %399 = arith.mulf %398, %1 : vector<8x32xf32>
    %400 = arith.addf %397, %399 : vector<8x32xf32>
    %c0_88 = arith.constant 0 : index
    %c896 = arith.constant 896 : index
    %401 = vector.load %arg3[%c0_88, %c896] : memref<8x1024xf32, #tpu.memory_space<vmem>>, vector<8x32xf32>
    tpu.vector_store %arg3[%c0_88, %c896], %400 {strides = array<i32>} : memref<8x1024xf32, #tpu.memory_space<vmem>>, vector<8x32xf32>,
    %402 = vector.broadcast %395 : vector<8x1xf32> to vector<8x32xf32>
    %403 = arith.mulf %402, %0 : vector<8x32xf32>
    %404 = vector.broadcast %394 : vector<8x1xf32> to vector<8x32xf32>
    %405 = arith.mulf %404, %1 : vector<8x32xf32>
    %406 = arith.subf %403, %405 : vector<8x32xf32>
    %c0_89 = arith.constant 0 : index
    %c896_90 = arith.constant 896 : index
    %407 = vector.load %arg4[%c0_89, %c896_90] : memref<8x1024xf32, #tpu.memory_space<vmem>>, vector<8x32xf32>
    tpu.vector_store %arg4[%c0_89, %c896_90], %406 {strides = array<i32>} : memref<8x1024xf32, #tpu.memory_space<vmem>>, vector<8x32xf32>,
    %408 = vector.extract_strided_slice %0 {offsets = [0, 29], sizes = [8, 1], strides = [1, 1]} : vector<8x32xf32> to vector<8x1xf32>
    %409 = vector.extract_strided_slice %1 {offsets = [0, 29], sizes = [8, 1], strides = [1, 1]} : vector<8x32xf32> to vector<8x1xf32>
    %410 = vector.broadcast %408 : vector<8x1xf32> to vector<8x32xf32>
    %411 = arith.mulf %410, %0 : vector<8x32xf32>
    %412 = vector.broadcast %409 : vector<8x1xf32> to vector<8x32xf32>
    %413 = arith.mulf %412, %1 : vector<8x32xf32>
    %414 = arith.addf %411, %413 : vector<8x32xf32>
    %c0_91 = arith.constant 0 : index
    %c928 = arith.constant 928 : index
    %415 = vector.load %arg3[%c0_91, %c928] : memref<8x1024xf32, #tpu.memory_space<vmem>>, vector<8x32xf32>
    tpu.vector_store %arg3[%c0_91, %c928], %414 {strides = array<i32>} : memref<8x1024xf32, #tpu.memory_space<vmem>>, vector<8x32xf32>,
    %416 = vector.broadcast %409 : vector<8x1xf32> to vector<8x32xf32>
    %417 = arith.mulf %416, %0 : vector<8x32xf32>
    %418 = vector.broadcast %408 : vector<8x1xf32> to vector<8x32xf32>
    %419 = arith.mulf %418, %1 : vector<8x32xf32>
    %420 = arith.subf %417, %419 : vector<8x32xf32>
    %c0_92 = arith.constant 0 : index
    %c928_93 = arith.constant 928 : index
    %421 = vector.load %arg4[%c0_92, %c928_93] : memref<8x1024xf32, #tpu.memory_space<vmem>>, vector<8x32xf32>
    tpu.vector_store %arg4[%c0_92, %c928_93], %420 {strides = array<i32>} : memref<8x1024xf32, #tpu.memory_space<vmem>>, vector<8x32xf32>,
    %422 = vector.extract_strided_slice %0 {offsets = [0, 30], sizes = [8, 1], strides = [1, 1]} : vector<8x32xf32> to vector<8x1xf32>
    %423 = vector.extract_strided_slice %1 {offsets = [0, 30], sizes = [8, 1], strides = [1, 1]} : vector<8x32xf32> to vector<8x1xf32>
    %424 = vector.broadcast %422 : vector<8x1xf32> to vector<8x32xf32>
    %425 = arith.mulf %424, %0 : vector<8x32xf32>
    %426 = vector.broadcast %423 : vector<8x1xf32> to vector<8x32xf32>
    %427 = arith.mulf %426, %1 : vector<8x32xf32>
    %428 = arith.addf %425, %427 : vector<8x32xf32>
    %c0_94 = arith.constant 0 : index
    %c960 = arith.constant 960 : index
    %429 = vector.load %arg3[%c0_94, %c960] : memref<8x1024xf32, #tpu.memory_space<vmem>>, vector<8x32xf32>
    tpu.vector_store %arg3[%c0_94, %c960], %428 {strides = array<i32>} : memref<8x1024xf32, #tpu.memory_space<vmem>>, vector<8x32xf32>,
    %430 = vector.broadcast %423 : vector<8x1xf32> to vector<8x32xf32>
    %431 = arith.mulf %430, %0 : vector<8x32xf32>
    %432 = vector.broadcast %422 : vector<8x1xf32> to vector<8x32xf32>
    %433 = arith.mulf %432, %1 : vector<8x32xf32>
    %434 = arith.subf %431, %433 : vector<8x32xf32>
    %c0_95 = arith.constant 0 : index
    %c960_96 = arith.constant 960 : index
    %435 = vector.load %arg4[%c0_95, %c960_96] : memref<8x1024xf32, #tpu.memory_space<vmem>>, vector<8x32xf32>
    tpu.vector_store %arg4[%c0_95, %c960_96], %434 {strides = array<i32>} : memref<8x1024xf32, #tpu.memory_space<vmem>>, vector<8x32xf32>,
    %436 = vector.extract_strided_slice %0 {offsets = [0, 31], sizes = [8, 1], strides = [1, 1]} : vector<8x32xf32> to vector<8x1xf32>
    %437 = vector.extract_strided_slice %1 {offsets = [0, 31], sizes = [8, 1], strides = [1, 1]} : vector<8x32xf32> to vector<8x1xf32>
    %438 = vector.broadcast %436 : vector<8x1xf32> to vector<8x32xf32>
    %439 = arith.mulf %438, %0 : vector<8x32xf32>
    %440 = vector.broadcast %437 : vector<8x1xf32> to vector<8x32xf32>
    %441 = arith.mulf %440, %1 : vector<8x32xf32>
    %442 = arith.addf %439, %441 : vector<8x32xf32>
    %c0_97 = arith.constant 0 : index
    %c992 = arith.constant 992 : index
    %443 = vector.load %arg3[%c0_97, %c992] : memref<8x1024xf32, #tpu.memory_space<vmem>>, vector<8x32xf32>
    tpu.vector_store %arg3[%c0_97, %c992], %442 {strides = array<i32>} : memref<8x1024xf32, #tpu.memory_space<vmem>>, vector<8x32xf32>,
    %444 = vector.broadcast %437 : vector<8x1xf32> to vector<8x32xf32>
    %445 = arith.mulf %444, %0 : vector<8x32xf32>
    %446 = vector.broadcast %436 : vector<8x1xf32> to vector<8x32xf32>
    %447 = arith.mulf %446, %1 : vector<8x32xf32>
    %448 = arith.subf %445, %447 : vector<8x32xf32>
    %c0_98 = arith.constant 0 : index
    %c992_99 = arith.constant 992 : index
    %449 = vector.load %arg4[%c0_98, %c992_99] : memref<8x1024xf32, #tpu.memory_space<vmem>>, vector<8x32xf32>
    tpu.vector_store %arg4[%c0_98, %c992_99], %448 {strides = array<i32>} : memref<8x1024xf32, #tpu.memory_space<vmem>>, vector<8x32xf32>,
    return
  }
  func.func @transform_0(%arg0: i32) -> (i32, i32) {
    %c0_i32 = arith.constant 0 : i32
    %c0_i32_0 = arith.constant 0 : i32
    return %arg0, %c0_i32 : i32, i32
  }
  func.func @transform_1(%arg0: i32) -> (i32, i32) {
    %c0_i32 = arith.constant 0 : i32
    %c0_i32_0 = arith.constant 0 : i32
    return %arg0, %c0_i32 : i32, i32
  }
  func.func @transform_2(%arg0: i32) -> (i32, i32) {
    %c0_i32 = arith.constant 0 : i32
    %c0_i32_0 = arith.constant 0 : i32
    return %arg0, %c0_i32 : i32, i32
  }
  func.func @transform_3(%arg0: i32) -> (i32, i32) {
    %c0_i32 = arith.constant 0 : i32
    %c0_i32_0 = arith.constant 0 : i32
    return %arg0, %c0_i32 : i32, i32
  }
}

</mosaic_0001>

<bundles_post_ra>
// kernel: tpu_custom_call.1
= control target key start
LH: loop header
LB: loop body
LE: loop exit
PB: predicated region body
PF: predicated region fallthrough
CT: control target
= control target key end

     0   :  { %9 = vsyncpa [#allocation3], 0  ;;  %s2119_s0 = inlined_call_operand.hbm [shape: f32[16,32], index: 0, kind: input, shape index: {}]   ;;  %s2120_s1 = inlined_call_operand.hbm [shape: f32[16,32], index: 1, kind: input, shape index: {}]   ;;  %s2121_s2 = inlined_call_operand.hbm [shape: f32[16,1024], index: 2, kind: output, shape index: {0}]   ;;  %s2122_s3 = inlined_call_operand.hbm [shape: f32[16,1024], index: 3, kind: output, shape index: {1}]  }
   0x1   :  { %11 = vsyncpa [#allocation3 + $0x1], 0 }
   0x2   :  { %12 = vsyncpa [#allocation6], 0 }
   0x3   :  { %14 = vsyncpa [#allocation6 + $0x1], 0 }
   0x4   :  { %15 = vsyncpa [#allocation4], 0 }
   0x5   :  { %17 = vsyncpa [#allocation4 + $0x1], 0 }
   0x6   :  { %18 = vsyncpa [#allocation9], 0 }
   0x7   :  { %20 = vsyncpa [#allocation9 + $0x1], 0  ;;  %s1502_s12 = smov 0   ;;  %s1504_s13 = smov 0  }
   0x8   :  { %s1506_s14 = smov 0   ;;  %s1508_s15 = smov 0  }
   0x9 LB: > { %s1523_s16 = sadd.s32 4294967295, %s1441_s15   ;;  %s1105_s17 = sadd.s32 4294967294, %s1441_s15   ;;  %s1441_s15 = sphi %s1508_s15, %s2141_s15   ;;  %s1437_s14 = sphi %s1506_s14, %s2140_s14   ;;  %s1433_s13 = sphi %s1504_s13, %s2139_s13   ;;  %s1429_s12 = sphi %s1502_s12, %s2138_s12  }
   0xa   : > { %s1527_s18 = sadd.s32 1, %s1441_s15   ;;  %s33_s19 = sadd.s32 1, %s1437_s14 }
   0xb   : > { %s30_s20 = ssub.s32 %s1441_s15, %s1527_s18  ;;  %p40_p0 = scmp.ne.s32.totalorder %s1437_s14, %s1433_s13 }
   0xc   : > { %p31_p1 = scmp.eq.s32.totalorder %s30_s20, 0  ;;  %p41_p2 = scmp.eq.s32.totalorder %s1441_s15, 0 }
   0xd   : > { %p46_p3 = scmp.ne.s32.totalorder %s1433_s13, %s1429_s12  ;;  %p47_p4 = scmp.eq.s32.totalorder %s1523_s16, 0 }
   0xe   : > { %s1539_s21 = scalar_select %p31_p1, %s1437_s14, %s33_s19  }
   0xf   : > { %p1541_p5 = por %p41_p2, %p40_p0  ;;  %p1545_p6 = por %p47_p4, %p46_p3 }
  0x10   : > { %p96_p7 = scmp.eq.s32.totalorder %s1523_s16, 1  ;;  %p102_p8 = scmp.eq.s32.totalorder %s1105_s17, 1 }
  0x11   : > { %s2126_s23 = scalar_select %p1545_p6, 1, 0 }
  0x12   : > { %p1149_p10 = scmp.lt.s32.totalorder %s1441_s15, 2  ;;  %p1552_p11 = por %p96_p7, %p40_p0 }
  0x13   : > { %p1556_p12 = por %p102_p8, %p46_p3  ;;  %s1561_s26 = sand.u32 1, %s1437_s14  }
  0x14   : > { %s2127_s24 = scalar_select %p1552_p11, 1, 0 }
  0x15   : > { %s2128_s25 = scalar_select %p1556_p12, 1, 0 }
  0x16   : > { %s1109_s27 = sshll.u32 %s1441_s15, 7  ;;  %s1108_s28 = sshll.u32 %s1561_s26, 3 }
  0x17   : > { %s1570_s4 = scalar_lea.hbm %s2119_s0, %s1109_s27  ;;  %s152_s5 = scalar_lea.vmem [#allocation2], %s1108_s28 }
  0x18   : > { %s159_s6 = sshll.u32 %s152_s5, 4  ;;  %p1576_p13 = pnand %p1149_p10, %p1541_p5  ;;  %s1580_s6 = int_to_ptr.vmem [resolvable:$true] %s159_s6 }
  0x19   : > { %s149_s8 = scalar_lea.sflag [#allocation3], %s1561_s26  ;;  %s1279_s9 = scalar_lea.hbm %s1570_s4, 128 }
  0x1a   : > { %p1280_p2 = scmp.ne.s32.totalorder %s1570_s4, %s1279_s9  ;;  %p1281_p3 = pneg %p1576_p13 }
  0x1b   : > { %s1284_s17 = scalar_lea.hbm %s2119_s0, 256  ;;  %p1285_p5 = scmp.lt.u32.totalorder %s1570_s4, %s2119_s0 }
  0x1c   : > { %p1282_p4 = pnand %p1281_p3, %p1280_p2  ;;  %p1286_p8 = scmp.lt.u32.totalorder %s1284_s17, %s1279_s9 }
  0x1d   : > { %p1288_p9 = scmp.lt.u32.totalorder %s1279_s9, %s1570_s4 }
  0x1e   : > { %p1283_p7 = pneg %p1282_p4  ;;  %p1287_p10 = por %p1286_p8, %p1285_p5 }
  0x20   : > { %p1289_p0 = por %p1288_p9, %p1287_p10 }
  0x22   : > { %p1290_p1 = pnand %p1289_p0, %p1283_p7 }
  0x24   : > { %1293 = shalt.err (!%p1290_p1)
}
  0x25   : > { %s1294_s22 = scalar_lea.vmem %s1580_s6, 128  ;;  %s1443_s29 = smov [#allocation2]  }
  0x26   : > { %p1295_p2 = scmp.ne.s32.totalorder %s1580_s6, %s1294_s22  ;;  %s1299_s30 = sshll.u32 %s1443_s29, 4  ;;  %s1300_s30 = int_to_ptr.vmem [resolvable:$false] %s1299_s30 }
  0x27   : > { %s1301_s5 = scalar_lea.vmem %s1300_s30, 256  ;;  %p1302_p11 = scmp.lt.s32.totalorder %s1580_s6, %s1300_s30 }
  0x28   : > { %p1297_p4 = pnand %p1295_p2, %p1281_p3  ;;  %p1303_p5 = scmp.lt.s32.totalorder %s1301_s5, %s1294_s22 }
  0x2a   : > { %p1298_p12 = pneg %p1297_p4  ;;  %p1304_p8 = por %p1303_p5, %p1302_p11 }
  0x2c   : > { %p1305_p9 = pnand %p1304_p8, %p1298_p12 }
  0x2e   : > { %1308 = shalt.err (!%p1305_p9)
}
  0x2f   : > { %1138 = dma.hbm_to_vmem [thread:$0]  (!%p1576_p13), %s1570_s4, 128, %s1580_s6, %s149_s8  }
  0x30   : > { %p2130_p0 = scmp.lt.s32.totalorder %s1441_s15, 3  ;;  %p2131_p1 = scmp.ge.s32.totalorder %s1441_s15, 1 }
  0x31   : > { %s1623_s17 = scalar_lea.hbm %s2120_s1, %s1109_s27  ;;  %s170_s19 = scalar_lea.vmem [#allocation5], %s1108_s28 }
  0x32   : > { %p1614_p7 = pnand %p2131_p1, %p2130_p0  ;;  %s177_s20 = sshll.u32 %s170_s19, 4  ;;  %s178_s20 = int_to_ptr.vmem [resolvable:$true] %s177_s20 }
  0x33   : > { %s167_s4 = scalar_lea.sflag [#allocation6], %s1561_s26  ;;  %s1309_s6 = scalar_lea.hbm %s1623_s17, 128 }
  0x34   : > { %s2132_s9 = scalar_select %p1614_p7, 1, 0 }
  0x35   : > { %p1310_p11 = scmp.ne.s32.totalorder %s1623_s17, %s1309_s6  ;;  %s1314_s27 = scalar_lea.hbm %s2120_s1, 256 }
  0x36   : > { %p1315_p2 = scmp.lt.u32.totalorder %s1623_s17, %s2120_s1  ;;  %p1316_p4 = scmp.lt.u32.totalorder %s1314_s27, %s1309_s6 }
  0x37   : > { %p1312_p12 = pnand %p1310_p11, %p1281_p3  ;;  %p1318_p8 = scmp.lt.u32.totalorder %s1309_s6, %s1623_s17 }
  0x38   : > { %p1317_p5 = por %p1316_p4, %p1315_p2 }
  0x39   : > { %p1313_p10 = pneg %p1312_p12 }
  0x3a   : > { %p1319_p9 = por %p1318_p8, %p1317_p5 }
  0x3c   : > { %p1320_p0 = pnand %p1319_p9, %p1313_p10 }
  0x3e   : > { %1323 = shalt.err (!%p1320_p0)
}
  0x3f   : > { %s1324_s26 = scalar_lea.vmem %s178_s20, 128  ;;  %s1444_s28 = smov [#allocation5]  }
  0x40   : > { %p1325_p1 = scmp.ne.s32.totalorder %s178_s20, %s1324_s26  ;;  %s1329_s5 = sshll.u32 %s1444_s28, 4  ;;  %s1330_s5 = int_to_ptr.vmem [resolvable:$false] %s1329_s5 }
  0x41   : > { %s1331_s10 = scalar_lea.vmem %s1330_s5, 256  ;;  %p1332_p6 = scmp.lt.s32.totalorder %s178_s20, %s1330_s5 }
  0x42   : > { %p1327_p11 = pnand %p1325_p1, %p1281_p3  ;;  %p1333_p7 = scmp.lt.s32.totalorder %s1331_s10, %s1324_s26 }
  0x44   : > { %p1328_p12 = pneg %p1327_p11  ;;  %p1334_p2 = por %p1333_p7, %p1332_p6 }
  0x46   : > { %p1335_p4 = pnand %p1334_p2, %p1328_p12 }
  0x48   : > { %1338 = shalt.err (!%p1335_p4)
}
  0x49   : > { %1141 = dma.hbm_to_vmem [thread:$0]  (!%p1576_p13), %s1623_s17, 128, %s178_s20, %s167_s4  }
  0x4a   : > { %p2133_p10 = scmp.ne.s32.totalorder %s2132_s9, 0 }
  0x4b   : > { %s1650_s11 = sand.u32 (!%p2133_p10), 1, %s1433_s13   ;;  %p2134_p6 = scmp.ne.s32.totalorder (!%p2133_p10), %s2126_s23, 0 }
  0x4c   : > { %186 = sbr.rel (%p2133_p10) target bundleno = 1060 (0x424), region = 28  ;;  %s1113_s19 = sshll.u32 (!%p2133_p10), %s1650_s11, 3 }
  0x4d   : > { %s189_s6 = scalar_lea.sflag (!%p2133_p10), [#allocation3], %s1650_s11  ;;  %s1654_s8 = scalar_lea.vmem (!%p2133_p10), [#allocation2], %s1113_s19 }
  0x53   : > { %1412 = dma.done.wait (%p2134_p6), %s189_s6, 128  }
  0x54   : > { %1414 = vsyncadd (%p2134_p6), %s189_s6, 4294967168  ;;  %s198_s7 = scalar_lea.sflag [#allocation6], %s1650_s11  ;;  %s1661_s9 = scalar_lea.vmem [#allocation5], %s1113_s19 }
  0x55   : > { %1416 = dma.done.wait (%p2134_p6), %s198_s7, 128  }
  0x56   : > { %1418 = vsyncadd (%p2134_p6), %s198_s7, 4294967168  ;;  %v1445_v0 = vmov 1   ;;  %v1446_v1 = vmov 0   ;;  %v1668_v2 = vld [vmem:[%s1654_s8] sm:$0xff]  ;;  %v1673_v3 = vld [vmem:[%s1661_s9] sm:$0xff]  ;;  %v1447_v4 = vmov 2  }
  0x57   : > { %1219 = vset.pattern.permute.xlu1 %v1445_v0  ;;  %1218 = vset.pattern.permute.xlu0 %v1446_v1  ;;  %v1448_v5 = vmov 3   ;;  %v1449_v6 = vmov 4   ;;  %v1450_v7 = vmov 5   ;;  %v1451_v8 = vmov 6   ;;  %s1115_s23 = sshll.u32 %s1650_s11, 6  ;;  %s1462_s4 = smov 32  }
  0x58   : > { %256 = vperm.xlu1 %1219, %v1668_v2   ;;  %238 = vperm.xlu0 %1218, %v1668_v2   ;;  %v1452_v9 = vmov 7   ;;  %v1453_v10 = vmov 8   ;;  %v1454_v11 = vmov 9   ;;  %v1455_v12 = vmov 10   ;;  %s1714_s17 = scalar_lea.vmem [#allocation7], %s1115_s23  ;;  %s1718_s20 = scalar_lea.vmem [#allocation8], %s1115_s23 }
  0x59   : > { %v1456_v13 = vmov 11   ;;  %v1457_v14 = vmov 12   ;;  %v1458_v15 = vmov 13   ;;  %v1459_v16 = vmov 14   ;;  %s1463_s22 = smov 64   ;;  %s1464_s27 = smov 96  }
  0x5a   : > { %v1460_v17 = vmov 15   ;;  %v1461_v18 = vmov 16   ;;  %vm249_vm0 = vcmask 261120   ;;  %vm270_vm1 = vcmask 523520   ;;  %s1125_s29 = sshll.u32 %s1523_s16, 10  ;;  %s966_s30 = sshll.u32 %s1714_s17, 4  ;;  %s2044_s30 = int_to_ptr.vmem [resolvable:$true] %s966_s30 }
  0x5b   : > { %vm295_vm2 = vcmask 785920   ;;  %vm320_vm3 = vcmask 1048320   ;;  %s980_s26 = sshll.u32 %s1718_s20, 4  ;;  %s2042_s10 = scalar_lea.hbm %s2121_s2, %s1125_s29  ;;  %s2051_s26 = int_to_ptr.vmem [resolvable:$true] %s980_s26 }
  0x5c   : > { %261 = vperm.xlu1 %1219, %v1673_v3   ;;  %244 = vperm.xlu0 %1218, %v1673_v3   ;;  %s2049_s6 = scalar_lea.hbm %s2122_s3, %s1125_s29  ;;  %s1339_s7 = scalar_lea.vmem %s2044_s30, 1024 }
  0x5d   : > { %p1340_p13 = scmp.ne.s32.totalorder %s2044_s30, %s1339_s7  ;;  %p2135_p3 = scmp.ne.s32.totalorder %s2127_s24, 0 }
  0x5f   : > { %p1341_p7 = pnand %p1340_p13, %p2135_p3 }
  0x60   : > { %1221 = vset.pattern.permute.xlu1 %v1447_v4  ;;  %1220 = vset.pattern.permute.xlu0 %v1447_v4 }
  0x61   : > { %286 = vperm.xlu1 %1221, %v1673_v3   ;;  %281 = vperm.xlu0 %1220, %v1668_v2   ;;  %p1342_p5 = pneg %p1341_p7 }
  0x65   : > { %1222 = vset.pattern.permute.xlu1 %v1448_v5  ;;  %1223 = vset.pattern.permute.xlu0 %v1448_v5 }
  0x66   : > { %306 = vperm.xlu1 %1222, %v1668_v2   ;;  %311 = vperm.xlu0 %1223, %v1673_v3  }
  0x6a   : > { %1225 = vset.pattern.permute.xlu1 %v1449_v6  ;;  %1224 = vset.pattern.permute.xlu0 %v1449_v6 }
  0x6b   : > { %336 = vperm.xlu1 %1225, %v1673_v3   ;;  %331 = vperm.xlu0 %1224, %v1668_v2  }
  0x6f   : > { %1226 = vset.pattern.permute.xlu1 %v1450_v7  ;;  %1227 = vset.pattern.permute.xlu0 %v1450_v7 }
  0x70   : > { %347 = vperm.xlu1 %1226, %v1668_v2   ;;  %352 = vperm.xlu0 %1227, %v1673_v3  }
  0x74   : > { %1229 = vset.pattern.permute.xlu1 %v1451_v8  ;;  %1228 = vset.pattern.permute.xlu0 %v1451_v8 }
  0x75   : > { %376 = vperm.xlu1 %1229, %v1673_v3   ;;  %371 = vperm.xlu0 %1228, %v1668_v2  }
  0x79   : > { %1230 = vset.pattern.permute.xlu1 %v1452_v9  ;;  %1231 = vset.pattern.permute.xlu0 %v1452_v9 }
  0x7a   : > { %395 = vperm.xlu1 %1230, %v1668_v2   ;;  %400 = vperm.xlu0 %1231, %v1673_v3  }
  0x7e   : > { %1233 = vset.pattern.permute.xlu1 %v1453_v10  ;;  %1232 = vset.pattern.permute.xlu0 %v1453_v10 }
  0x7f   : > { %424 = vperm.xlu1 %1233, %v1673_v3   ;;  %419 = vperm.xlu0 %1232, %v1668_v2  }
  0x83   : > { %1234 = vset.pattern.permute.xlu1 %v1454_v11  ;;  %1235 = vset.pattern.permute.xlu0 %v1454_v11 }
  0x84   : > { %435 = vperm.xlu1 %1234, %v1668_v2   ;;  %440 = vperm.xlu0 %1235, %v1673_v3  }
  0x88   : > { %1237 = vset.pattern.permute.xlu1 %v1455_v12  ;;  %1236 = vset.pattern.permute.xlu0 %v1455_v12 }
  0x89   : > { %464 = vperm.xlu1 %1237, %v1673_v3   ;;  %459 = vperm.xlu0 %1236, %v1668_v2  }
  0x8d   : > { %1238 = vset.pattern.permute.xlu1 %v1456_v13  ;;  %1239 = vset.pattern.permute.xlu0 %v1456_v13 }
  0x8e   : > { %483 = vperm.xlu1 %1238, %v1668_v2   ;;  %488 = vperm.xlu0 %1239, %v1673_v3  }
  0x92   : > { %1241 = vset.pattern.permute.xlu1 %v1457_v14  ;;  %1240 = vset.pattern.permute.xlu0 %v1457_v14 }
  0x93   : > { %512 = vperm.xlu1 %1241, %v1673_v3   ;;  %507 = vperm.xlu0 %1240, %v1668_v2  }
  0x97   : > { %1242 = vset.pattern.permute.xlu1 %v1458_v15  ;;  %1243 = vset.pattern.permute.xlu0 %v1458_v15 }
  0x98   : > { %523 = vperm.xlu1 %1242, %v1668_v2   ;;  %528 = vperm.xlu0 %1243, %v1673_v3  }
  0x9c   : > { %1245 = vset.pattern.permute.xlu1 %v1459_v16  ;;  %1244 = vset.pattern.permute.xlu0 %v1459_v16 }
  0x9d   : > { %552 = vperm.xlu1 %1245, %v1673_v3   ;;  %547 = vperm.xlu0 %1244, %v1668_v2  }
  0xa1   : > { %1246 = vset.pattern.permute.xlu1 %v1460_v17  ;;  %1247 = vset.pattern.permute.xlu0 %v1460_v17 }
  0xa2   : > { %571 = vperm.xlu1 %1246, %v1668_v2   ;;  %576 = vperm.xlu0 %1247, %v1673_v3  }
  0xa6   : > { %1249 = vset.pattern.permute.xlu1 %v1461_v18  ;;  %1248 = vset.pattern.permute.xlu0 %v1461_v18 }
  0xd7   : > { %v257_v19 = vpop.permute.xlu1 %256  ;;  %v239_v20 = vpop.permute.xlu0 %238 }
  0xd8   : > { %v259_v21 = vmul.f32 %v257_v19, %v1668_v2  ;;  %v273_v22 = vmul.f32 %v257_v19, %v1673_v3  ;;  %v241_v23 = vmul.f32 %v239_v20, %v1668_v2  ;;  %v252_v24 = vmul.f32 %v239_v20, %v1673_v3 }
  0xdb   : > { %v262_v25 = vpop.permute.xlu1 %261  ;;  %v245_v26 = vpop.permute.xlu0 %244 }
  0xdc   : > { %v264_v27 = vmul.f32 %v262_v25, %v1673_v3  ;;  %v272_v28 = vmul.f32 %v262_v25, %v1668_v2  ;;  %v247_v29 = vmul.f32 %v245_v26, %v1673_v3  ;;  %v251_v30 = vmul.f32 %v245_v26, %v1668_v2 }
  0xde   : > { %v248_v31 = vadd.f32 %v247_v29, %v241_v23  ;;  %v253_v32 = vsub.f32 %v251_v30, %v252_v24  ;;  %v274_v33 = vsub.f32 %v272_v28, %v273_v22  ;;  %v265_v34 = vadd.f32 %v264_v27, %v259_v21 }
  0xe0   : > { %250 = vst.msk [vmem:[%s1714_s17] sm:$0xff] %vm249_vm0, %v248_v31  ;;  %254 = vst.msk [vmem:[%s1718_s20] sm:$0xff] %vm249_vm0, %v253_v32  ;;  %276 = vrot.lane.b32.xlu1 %v274_v33, %s1462_s4  ;;  %v287_v35 = vpop.permute.xlu1 %286  ;;  %267 = vrot.lane.b32.xlu0 %v265_v34, %s1462_s4  ;;  %v282_v36 = vpop.permute.xlu0 %281 }
  0xe1   : > { %v289_v37 = vmul.f32 %v287_v35, %v1673_v3  ;;  %v297_v38 = vmul.f32 %v287_v35, %v1668_v2  ;;  %v284_v39 = vmul.f32 %v282_v36, %v1668_v2  ;;  %v298_v40 = vmul.f32 %v282_v36, %v1673_v3 }
  0xe3   : > { %v290_v41 = vadd.f32 %v289_v37, %v284_v39  ;;  %v299_v42 = vsub.f32 %v297_v38, %v298_v40 }
  0xe5   : > { %v307_v43 = vpop.permute.xlu1 %306  ;;  %301 = vrot.lane.b32.xlu0 %v299_v42, %s1463_s22  ;;  %292 = vrot.lane.b32.xlu1 %v290_v41, %s1463_s22  ;;  %v312_v44 = vpop.permute.xlu0 %311 }
  0xe6   : > { %v309_v45 = vmul.f32 %v307_v43, %v1668_v2  ;;  %v314_v46 = vmul.f32 %v312_v44, %v1673_v3  ;;  %v323_v47 = vmul.f32 %v307_v43, %v1673_v3  ;;  %v322_v49 = vmul.f32 %v312_v44, %v1668_v2 }
  0xe8   : > { %v315_v48 = vadd.f32 %v314_v46, %v309_v45  ;;  %v324_v56 = vsub.f32 %v322_v49, %v323_v47 }
  0xea   : > { %v337_v50 = vpop.permute.xlu1 %336  ;;  %317 = vrot.lane.b32.xlu1 %v315_v48, %s1464_s27  ;;  %v332_v51 = vpop.permute.xlu0 %331 }
  0xeb   : > { %v339_v52 = vmul.f32 %v337_v50, %v1673_v3  ;;  %v342_v53 = vmul.f32 %v337_v50, %v1668_v2  ;;  %v334_v54 = vmul.f32 %v332_v51, %v1668_v2  ;;  %v343_v55 = vmul.f32 %v332_v51, %v1673_v3 }
  0xed   : > { %v340_v57 = vadd.f32 %v339_v52, %v334_v54  ;;  %v344_v58 = vsub.f32 %v342_v53, %v343_v55 }
  0xee   : > { %326 = vrot.lane.b32.xlu1 %v324_v56, %s1464_s27 }
  0xef   : > { %341 = vst.msk [vmem:[%s1714_s17 + $0x8] sm:$0xff] %vm249_vm0, %v340_v57  ;;  %345 = vst.msk [vmem:[%s1718_s20 + $0x8] sm:$0xff] %vm249_vm0, %v344_v58  ;;  %v348_v59 = vpop.permute.xlu1 %347  ;;  %v353_v60 = vpop.permute.xlu0 %352 }
  0xf0   : > { %v350_v61 = vmul.f32 %v348_v59, %v1668_v2  ;;  %v355_v62 = vmul.f32 %v353_v60, %v1673_v3  ;;  %v363_v63 = vmul.f32 %v348_v59, %v1673_v3  ;;  %v362_v1 = vmul.f32 %v353_v60, %v1668_v2 }
  0xf2   : > { %v356_v0 = vadd.f32 %v355_v62, %v350_v61  ;;  %v364_v8 = vsub.f32 %v362_v1, %v363_v63 }
  0xf4   : > { %v377_v4 = vpop.permute.xlu1 %376  ;;  %358 = vrot.lane.b32.xlu1 %v356_v0, %s1462_s4  ;;  %v372_v5 = vpop.permute.xlu0 %371 }
  0xf5   : > { %v386_v6 = vmul.f32 %v377_v4, %v1668_v2  ;;  %v387_v7 = vmul.f32 %v372_v5, %v1673_v3  ;;  %v379_v9 = vmul.f32 %v377_v4, %v1673_v3  ;;  %v374_v10 = vmul.f32 %v372_v5, %v1668_v2 }
  0xf7   : > { %v388_v11 = vsub.f32 %v386_v6, %v387_v7  ;;  %v380_v14 = vadd.f32 %v379_v9, %v374_v10 }
  0xf8   : > { %366 = vrot.lane.b32.xlu1 %v364_v8, %s1462_s4 }
  0xf9   : > { %v396_v12 = vpop.permute.xlu1 %395  ;;  %390 = vrot.lane.b32.xlu0 %v388_v11, %s1463_s22  ;;  %v401_v13 = vpop.permute.xlu0 %400 }
  0xfa   : > { %v398_v15 = vmul.f32 %v396_v12, %v1668_v2  ;;  %v403_v16 = vmul.f32 %v401_v13, %v1673_v3  ;;  %v411_v17 = vmul.f32 %v396_v12, %v1673_v3  ;;  %v410_v19 = vmul.f32 %v401_v13, %v1668_v2 }
  0xfc   : > { %382 = vrot.lane.b32.xlu1 %v380_v14, %s1463_s22  ;;  %v404_v18 = vadd.f32 %v403_v16, %v398_v15  ;;  %v412_v28 = vsub.f32 %v410_v19, %v411_v17 }
  0xfe   : > { %v425_v20 = vpop.permute.xlu1 %424  ;;  %v420_v21 = vpop.permute.xlu0 %419 }
  0xff   : > { %v427_v22 = vmul.f32 %v425_v20, %v1673_v3  ;;  %v430_v23 = vmul.f32 %v425_v20, %v1668_v2  ;;  %v422_v24 = vmul.f32 %v420_v21, %v1668_v2  ;;  %v431_v25 = vmul.f32 %v420_v21, %v1673_v3 }
 0x100   : > { %406 = vrot.lane.b32.xlu1 %v404_v18, %s1464_s27  ;;  %v1465_v20 = vmov 17  }
 0x101   : > { %v428_v26 = vadd.f32 %v427_v22, %v422_v24  ;;  %v432_v27 = vsub.f32 %v430_v23, %v431_v25  ;;  %v1466_v24 = vmov 18  }
 0x103   : > { %429 = vst.msk [vmem:[%s1714_s17 + $0x10] sm:$0xff] %vm249_vm0, %v428_v26  ;;  %433 = vst.msk [vmem:[%s1718_s20 + $0x10] sm:$0xff] %vm249_vm0, %v432_v27  ;;  %v436_v29 = vpop.permute.xlu1 %435  ;;  %v441_v30 = vpop.permute.xlu0 %440 }
 0x104   : > { %v438_v31 = vmul.f32 %v436_v29, %v1668_v2  ;;  %v443_v32 = vmul.f32 %v441_v30, %v1673_v3  ;;  %414 = vrot.lane.b32.xlu1 %v412_v28, %s1464_s27  ;;  %v451_v33 = vmul.f32 %v436_v29, %v1673_v3  ;;  %v450_v35 = vmul.f32 %v441_v30, %v1668_v2 }
 0x106   : > { %v444_v34 = vadd.f32 %v443_v32, %v438_v31  ;;  %v452_v40 = vsub.f32 %v450_v35, %v451_v33 }
 0x108   : > { %v465_v36 = vpop.permute.xlu1 %464  ;;  %446 = vrot.lane.b32.xlu1 %v444_v34, %s1462_s4  ;;  %v460_v37 = vpop.permute.xlu0 %459 }
 0x109   : > { %v474_v38 = vmul.f32 %v465_v36, %v1668_v2  ;;  %v475_v39 = vmul.f32 %v460_v37, %v1673_v3  ;;  %v467_v41 = vmul.f32 %v465_v36, %v1673_v3  ;;  %v462_v42 = vmul.f32 %v460_v37, %v1668_v2 }
 0x10b   : > { %v476_v43 = vsub.f32 %v474_v38, %v475_v39  ;;  %v468_v46 = vadd.f32 %v467_v41, %v462_v42 }
 0x10c   : > { %454 = vrot.lane.b32.xlu1 %v452_v40, %s1462_s4 }
 0x10d   : > { %v484_v44 = vpop.permute.xlu1 %483  ;;  %478 = vrot.lane.b32.xlu0 %v476_v43, %s1463_s22  ;;  %v489_v45 = vpop.permute.xlu0 %488 }
 0x10e   : > { %v486_v47 = vmul.f32 %v484_v44, %v1668_v2  ;;  %v491_v48 = vmul.f32 %v489_v45, %v1673_v3  ;;  %v499_v49 = vmul.f32 %v484_v44, %v1673_v3  ;;  %v498_v51 = vmul.f32 %v489_v45, %v1668_v2 }
 0x110   : > { %470 = vrot.lane.b32.xlu1 %v468_v46, %s1463_s22  ;;  %v492_v50 = vadd.f32 %v491_v48, %v486_v47  ;;  %v500_v60 = vsub.f32 %v498_v51, %v499_v49 }
 0x112   : > { %v513_v52 = vpop.permute.xlu1 %512  ;;  %v508_v53 = vpop.permute.xlu0 %507 }
 0x113   : > { %v515_v54 = vmul.f32 %v513_v52, %v1673_v3  ;;  %v518_v55 = vmul.f32 %v513_v52, %v1668_v2  ;;  %v510_v56 = vmul.f32 %v508_v53, %v1668_v2  ;;  %v519_v57 = vmul.f32 %v508_v53, %v1673_v3 }
 0x114   : > { %494 = vrot.lane.b32.xlu1 %v492_v50, %s1464_s27 }
 0x115   : > { %v516_v58 = vadd.f32 %v515_v54, %v510_v56  ;;  %v520_v59 = vsub.f32 %v518_v55, %v519_v57 }
 0x117   : > { %517 = vst.msk [vmem:[%s1714_s17 + $0x18] sm:$0xff] %vm249_vm0, %v516_v58  ;;  %521 = vst.msk [vmem:[%s1718_s20 + $0x18] sm:$0xff] %vm249_vm0, %v520_v59  ;;  %v524_v61 = vpop.permute.xlu1 %523  ;;  %v529_v62 = vpop.permute.xlu0 %528 }
 0x118   : > { %v526_v63 = vmul.f32 %v524_v61, %v1668_v2  ;;  %v531_v0 = vmul.f32 %v529_v62, %v1673_v3  ;;  %502 = vrot.lane.b32.xlu1 %v500_v60, %s1464_s27  ;;  %v539_v1 = vmul.f32 %v524_v61, %v1673_v3  ;;  %v538_v5 = vmul.f32 %v529_v62, %v1668_v2 }
 0x11a   : > { %v532_v4 = vadd.f32 %v531_v0, %v526_v63  ;;  %v540_v12 = vsub.f32 %v538_v5, %v539_v1  ;;  %v1467_v1 = vmov 19  }
 0x11c   : > { %534 = vrot.lane.b32.xlu1 %v532_v4, %s1462_s4  ;;  %v553_v6 = vpop.permute.xlu1 %552  ;;  %v548_v7 = vpop.permute.xlu0 %547 }
 0x11d   : > { %v555_v8 = vmul.f32 %v553_v6, %v1673_v3  ;;  %v562_v9 = vmul.f32 %v553_v6, %v1668_v2  ;;  %v550_v10 = vmul.f32 %v548_v7, %v1668_v2  ;;  %v563_v11 = vmul.f32 %v548_v7, %v1673_v3 }
 0x11f   : > { %v564_v13 = vsub.f32 %v562_v9, %v563_v11  ;;  %v556_v14 = vadd.f32 %v555_v8, %v550_v10 }
 0x120   : > { %542 = vrot.lane.b32.xlu1 %v540_v12, %s1462_s4 }
 0x121   : > { %566 = vrot.lane.b32.xlu0 %v564_v13, %s1463_s22  ;;  %v572_v15 = vpop.permute.xlu1 %571  ;;  %v577_v16 = vpop.permute.xlu0 %576 }
 0x122   : > { %v574_v17 = vmul.f32 %v572_v15, %v1668_v2  ;;  %v579_v18 = vmul.f32 %v577_v16, %v1673_v3  ;;  %v587_v21 = vmul.f32 %v572_v15, %v1673_v3  ;;  %v586_v22 = vmul.f32 %v577_v16, %v1668_v2 }
 0x123   : > { %v1469_v15 = vmov 20   ;;  %v1470_v16 = vmov 25  }
 0x124   : > { %558 = vrot.lane.b32.xlu1 %v556_v14, %s1463_s22  ;;  %v580_v19 = vadd.f32 %v579_v18, %v574_v17  ;;  %v588_v23 = vsub.f32 %v586_v22, %v587_v21  ;;  %v1468_v14 = vmov 21   ;;  %v1471_v17 = vmov 29  }
 0x125   : > { %595 = vperm.xlu0 %1248, %v1668_v2   ;;  %v1472_v18 = vmov 26   ;;  %v1475_v21 = vmov 31  }
 0x128   : > { %600 = vperm.xlu1 %1249, %v1673_v3  }
 0x129   : > { %1251 = vset.pattern.permute.xlu0 %v1465_v20 }
 0x12a   : > { %616 = vperm.xlu0 %1251, %v1673_v3  }
 0x12c   : > { %582 = vrot.lane.b32.xlu1 %v580_v19, %s1464_s27  ;;  %v1473_v19 = vmov 30  }
 0x12d   : > { %1250 = vset.pattern.permute.xlu1 %v1465_v20  ;;  %v1474_v20 = vmov 27  }
 0x12e   : > { %1252 = vset.pattern.permute.xlu0 %v1466_v24 }
 0x12f   : > { %635 = vperm.xlu0 %1252, %v1668_v2  }
 0x130   : > { %590 = vrot.lane.b32.xlu1 %v588_v23, %s1464_s27 }
 0x133   : > { %1255 = vset.pattern.permute.xlu0 %v1467_v1 }
 0x134   : > { %611 = vperm.xlu1 %1250, %v1668_v2  }
 0x138   : > { %1253 = vset.pattern.permute.xlu1 %v1466_v24  ;;  %v1476_v24 = vmov 24  }
 0x152   : > { %v277_v25 = vpop.permute.xlu1 %276  ;;  %v268_v26 = vpop.permute.xlu0 %267 }
 0x153   : > { %279 = vst.msk [vmem:[%s1718_s20] sm:$0xff] %vm270_vm1, %v277_v25  ;;  %271 = vst.msk [vmem:[%s1714_s17] sm:$0xff] %vm270_vm1, %v268_v26 }
 0x157   : > { %v293_v27 = vpop.permute.xlu1 %292  ;;  %v302_v28 = vpop.permute.xlu0 %301 }
 0x158   : > { %296 = vst.msk [vmem:[%s1714_s17] sm:$0xff] %vm295_vm2, %v293_v27  ;;  %304 = vst.msk [vmem:[%s1718_s20] sm:$0xff] %vm295_vm2, %v302_v28 }
 0x15c   : > { %v318_v29 = vpop.permute.xlu1 %317 }
 0x15d   : > { %321 = vst.msk [vmem:[%s1714_s17] sm:$0xff] %vm320_vm3, %v318_v29 }
 0x160   : > { %v327_v30 = vpop.permute.xlu1 %326 }
 0x161   : > { %329 = vst.msk [vmem:[%s1718_s20] sm:$0xff] %vm320_vm3, %v327_v30 }
 0x166   : > { %v359_v31 = vpop.permute.xlu1 %358 }
 0x167   : > { %361 = vst.msk [vmem:[%s1714_s17 + $0x8] sm:$0xff] %vm270_vm1, %v359_v31 }
 0x16a   : > { %v367_v32 = vpop.permute.xlu1 %366 }
 0x16b   : > { %369 = vst.msk [vmem:[%s1718_s20 + $0x8] sm:$0xff] %vm270_vm1, %v367_v32  ;;  %v391_v33 = vpop.permute.xlu0 %390 }
 0x16c   : > { %393 = vst.msk [vmem:[%s1718_s20 + $0x8] sm:$0xff] %vm295_vm2, %v391_v33  ;;  %v1477_v33 = vmov 22  }
 0x16e   : > { %v383_v34 = vpop.permute.xlu1 %382 }
 0x16f   : > { %385 = vst.msk [vmem:[%s1714_s17 + $0x8] sm:$0xff] %vm295_vm2, %v383_v34  ;;  %v1478_v34 = vmov 23  }
 0x172   : > { %v407_v35 = vpop.permute.xlu1 %406 }
 0x173   : > { %409 = vst.msk [vmem:[%s1714_s17 + $0x8] sm:$0xff] %vm320_vm3, %v407_v35  ;;  %v1479_v35 = vmov 28  }
 0x176   : > { %v415_v36 = vpop.permute.xlu1 %414 }
 0x177   : > { %417 = vst.msk [vmem:[%s1718_s20 + $0x8] sm:$0xff] %vm320_vm3, %v415_v36 }
 0x17a   : > { %v447_v37 = vpop.permute.xlu1 %446 }
 0x17b   : > { %449 = vst.msk [vmem:[%s1714_s17 + $0x10] sm:$0xff] %vm270_vm1, %v447_v37 }
 0x17e   : > { %v455_v38 = vpop.permute.xlu1 %454 }
 0x17f   : > { %457 = vst.msk [vmem:[%s1718_s20 + $0x10] sm:$0xff] %vm270_vm1, %v455_v38  ;;  %v479_v39 = vpop.permute.xlu0 %478 }
 0x180   : > { %481 = vst.msk [vmem:[%s1718_s20 + $0x10] sm:$0xff] %vm295_vm2, %v479_v39 }
 0x182   : > { %v471_v40 = vpop.permute.xlu1 %470 }
 0x183   : > { %473 = vst.msk [vmem:[%s1714_s17 + $0x10] sm:$0xff] %vm295_vm2, %v471_v40 }
 0x186   : > { %v495_v41 = vpop.permute.xlu1 %494 }
 0x187   : > { %497 = vst.msk [vmem:[%s1714_s17 + $0x10] sm:$0xff] %vm320_vm3, %v495_v41 }
 0x18a   : > { %v503_v42 = vpop.permute.xlu1 %502 }
 0x18b   : > { %505 = vst.msk [vmem:[%s1718_s20 + $0x10] sm:$0xff] %vm320_vm3, %v503_v42 }
 0x18e   : > { %v535_v43 = vpop.permute.xlu1 %534 }
 0x18f   : > { %537 = vst.msk [vmem:[%s1714_s17 + $0x18] sm:$0xff] %vm270_vm1, %v535_v43 }
 0x192   : > { %v543_v44 = vpop.permute.xlu1 %542 }
 0x193   : > { %545 = vst.msk [vmem:[%s1718_s20 + $0x18] sm:$0xff] %vm270_vm1, %v543_v44  ;;  %v567_v45 = vpop.permute.xlu0 %566 }
 0x194   : > { %569 = vst.msk [vmem:[%s1718_s20 + $0x18] sm:$0xff] %vm295_vm2, %v567_v45 }
 0x196   : > { %v559_v46 = vpop.permute.xlu1 %558 }
 0x197   : > { %561 = vst.msk [vmem:[%s1714_s17 + $0x18] sm:$0xff] %vm295_vm2, %v559_v46 }
 0x1a4   : > { %v596_v47 = vpop.permute.xlu0 %595 }
 0x1a5   : > { %v598_v48 = vmul.f32 %v596_v47, %v1668_v2  ;;  %v607_v49 = vmul.f32 %v596_v47, %v1673_v3 }
 0x1a7   : > { %v601_v50 = vpop.permute.xlu1 %600 }
 0x1a8   : > { %v603_v51 = vmul.f32 %v601_v50, %v1673_v3  ;;  %v606_v52 = vmul.f32 %v601_v50, %v1668_v2 }
 0x1a9   : > { %v617_v57 = vpop.permute.xlu0 %616 }
 0x1aa   : > { %v604_v53 = vadd.f32 %v603_v51, %v598_v48  ;;  %v608_v54 = vsub.f32 %v606_v52, %v607_v49  ;;  %v619_v58 = vmul.f32 %v617_v57, %v1673_v3  ;;  %v626_v63 = vmul.f32 %v617_v57, %v1668_v2 }
 0x1ab   : > { %v583_v55 = vpop.permute.xlu1 %582 }
 0x1ac   : > { %605 = vst.msk [vmem:[%s1714_s17 + $0x20] sm:$0xff] %vm249_vm0, %v604_v53  ;;  %609 = vst.msk [vmem:[%s1718_s20 + $0x20] sm:$0xff] %vm249_vm0, %v608_v54 }
 0x1ad   : > { %585 = vst.msk [vmem:[%s1714_s17 + $0x18] sm:$0xff] %vm320_vm3, %v583_v55 }
 0x1ae   : > { %v636_v6 = vpop.permute.xlu0 %635 }
 0x1af   : > { %v591_v56 = vpop.permute.xlu1 %590  ;;  %v638_v7 = vmul.f32 %v636_v6, %v1668_v2  ;;  %v651_v8 = vmul.f32 %v636_v6, %v1673_v3 }
 0x1b0   : > { %593 = vst.msk [vmem:[%s1718_s20 + $0x18] sm:$0xff] %vm320_vm3, %v591_v56 }
 0x1b3   : > { %v612_v59 = vpop.permute.xlu1 %611 }
 0x1b4   : > { %v614_v60 = vmul.f32 %v612_v59, %v1668_v2  ;;  %v627_v61 = vmul.f32 %v612_v59, %v1673_v3 }
 0x1b6   : > { %v620_v62 = vadd.f32 %v619_v58, %v614_v60  ;;  %v628_v0 = vsub.f32 %v626_v63, %v627_v61 }
 0x1b8   : > { %622 = vrot.lane.b32.xlu1 %v620_v62, %s1462_s4 }
 0x1bc   : > { %630 = vrot.lane.b32.xlu1 %v628_v0, %s1462_s4 }
 0x1c0   : > { %640 = vperm.xlu1 %1253, %v1673_v3  }
 0x1c4   : > { %1254 = vset.pattern.permute.xlu1 %v1467_v1 }
 0x22a   : > { %v623_v4 = vpop.permute.xlu1 %622 }
 0x22b   : > { %625 = vst.msk [vmem:[%s1714_s17 + $0x20] sm:$0xff] %vm270_vm1, %v623_v4 }
 0x22e   : > { %v631_v5 = vpop.permute.xlu1 %630 }
 0x22f   : > { %633 = vst.msk [vmem:[%s1718_s20 + $0x20] sm:$0xff] %vm270_vm1, %v631_v5 }
 0x23f   : > { %v641_v9 = vpop.permute.xlu1 %640 }
 0x240   : > { %v643_v10 = vmul.f32 %v641_v9, %v1673_v3  ;;  %v650_v11 = vmul.f32 %v641_v9, %v1668_v2 }
 0x242   : > { %v644_v12 = vadd.f32 %v643_v10, %v638_v7  ;;  %v652_v13 = vsub.f32 %v650_v11, %v651_v8 }
 0x244   : > { %654 = vrot.lane.b32.xlu0 %v652_v13, %s1463_s22  ;;  %646 = vrot.lane.b32.xlu1 %v644_v12, %s1463_s22 }
 0x248   : > { %664 = vperm.xlu0 %1255, %v1673_v3   ;;  %659 = vperm.xlu1 %1254, %v1668_v2  }
 0x24c   : > { %1257 = vset.pattern.permute.xlu1 %v1468_v14  ;;  %1256 = vset.pattern.permute.xlu0 %v1469_v15 }
 0x24d   : > { %683 = vperm.xlu0 %1256, %v1668_v2  }
 0x251   : > { %1258 = vset.pattern.permute.xlu0 %v1470_v16 }
 0x252   : > { %787 = vperm.xlu0 %1258, %v1668_v2  }
 0x256   : > { %1261 = vset.pattern.permute.xlu0 %v1471_v17 }
 0x257   : > { %880 = vperm.xlu0 %1261, %v1673_v3  }
 0x25b   : > { %1263 = vset.pattern.permute.xlu0 %v1472_v18 }
 0x25c   : > { %811 = vperm.xlu0 %1263, %v1668_v2  }
 0x260   : > { %1266 = vset.pattern.permute.xlu0 %v1473_v19 }
 0x261   : > { %904 = vperm.xlu0 %1266, %v1673_v3  }
 0x265   : > { %1268 = vset.pattern.permute.xlu0 %v1474_v20 }
 0x266   : > { %835 = vperm.xlu0 %1268, %v1668_v2  }
 0x26a   : > { %1271 = vset.pattern.permute.xlu0 %v1475_v21 }
 0x26b   : > { %928 = vperm.xlu0 %1271, %v1673_v3  }
 0x26f   : > { %1274 = vset.pattern.permute.xlu0 %v1476_v24 }
 0x270   : > { %776 = vperm.xlu0 %1274, %v1673_v3  }
 0x274   : > { %1276 = vset.pattern.permute.xlu0 %v1475_v21 }
 0x2b6   : > { %v655_v22 = vpop.permute.xlu0 %654  ;;  %v647_v23 = vpop.permute.xlu1 %646 }
 0x2b7   : > { %657 = vst.msk [vmem:[%s1718_s20 + $0x20] sm:$0xff] %vm295_vm2, %v655_v22  ;;  %649 = vst.msk [vmem:[%s1714_s17 + $0x20] sm:$0xff] %vm295_vm2, %v647_v23 }
 0x2c7   : > { %v665_v25 = vpop.permute.xlu0 %664  ;;  %v660_v26 = vpop.permute.xlu1 %659 }
 0x2c8   : > { %v667_v27 = vmul.f32 %v665_v25, %v1673_v3  ;;  %v662_v28 = vmul.f32 %v660_v26, %v1668_v2  ;;  %v674_v29 = vmul.f32 %v665_v25, %v1668_v2  ;;  %v675_v31 = vmul.f32 %v660_v26, %v1673_v3 }
 0x2ca   : > { %v668_v30 = vadd.f32 %v667_v27, %v662_v28  ;;  %v676_v32 = vsub.f32 %v674_v29, %v675_v31 }
 0x2cc   : > { %670 = vrot.lane.b32.xlu1 %v668_v30, %s1464_s27  ;;  %v1932_v38 = vpop.permute.xlu0 %683 }
 0x2d0   : > { %678 = vrot.lane.b32.xlu1 %v676_v32, %s1464_s27 }
 0x2d1   : > { %v788_v41 = vpop.permute.xlu0 %787 }
 0x2d2   : > { %v790_v48 = vmul.f32 %v788_v41, %v1668_v2  ;;  %v803_v49 = vmul.f32 %v788_v41, %v1673_v3 }
 0x2d4   : > { %699 = vperm.xlu1 %1257, %v1668_v2  }
 0x2d6   : > { %v881_v53 = vpop.permute.xlu0 %880 }
 0x2d7   : > { %v883_v56 = vmul.f32 %v881_v53, %v1673_v3  ;;  %v890_v57 = vmul.f32 %v881_v53, %v1668_v2  ;;  %v1278_v53 = vld [vmem:[%s1661_s9] sm:$0xff]  ;;  %s1480_s9 = smov [#allocation7]  }
 0x2d8   : > { %704 = vperm.xlu1 %1257, %v1673_v3   ;;  %s1343_s23 = sshll.u32 %s1480_s9, 4  ;;  %s1344_s23 = int_to_ptr.vmem [resolvable:$false] %s1343_s23 }
 0x2d9   : > { %p1346_p8 = scmp.lt.s32.totalorder %s2044_s30, %s1344_s23 }
 0x2db   : > { %v812_v1 = vpop.permute.xlu0 %811 }
 0x2dc   : > { %1259 = vset.pattern.permute.xlu1 %v1470_v16  ;;  %v814_v10 = vmul.f32 %v812_v1, %v1668_v2  ;;  %v827_v11 = vmul.f32 %v812_v1, %v1673_v3 }
 0x2dd   : > { %792 = vperm.xlu1 %1259, %v1673_v3  }
 0x2e1   : > { %1260 = vset.pattern.permute.xlu1 %v1471_v17 }
 0x2e2   : > { %875 = vperm.xlu1 %1260, %v1668_v2  }
 0x2e6   : > { %1262 = vset.pattern.permute.xlu1 %v1477_v33 }
 0x2e7   : > { %723 = vperm.xlu1 %1262, %v1668_v2  }
 0x2eb   : > { %728 = vperm.xlu1 %1262, %v1673_v3  }
 0x2ef   : > { %1264 = vset.pattern.permute.xlu1 %v1472_v18 }
 0x2f0   : > { %816 = vperm.xlu1 %1264, %v1673_v3  }
 0x2f4   : > { %1265 = vset.pattern.permute.xlu1 %v1473_v19 }
 0x2f5   : > { %899 = vperm.xlu1 %1265, %v1668_v2  }
 0x2f9   : > { %1267 = vset.pattern.permute.xlu1 %v1478_v34 }
 0x2fa   : > { %747 = vperm.xlu1 %1267, %v1668_v2  }
 0x2fe   : > { %752 = vperm.xlu1 %1267, %v1673_v3  }
 0x302   : > { %1269 = vset.pattern.permute.xlu1 %v1474_v20 }
 0x303   : > { %840 = vperm.xlu1 %1269, %v1673_v3  }
 0x307   : > { %1270 = vset.pattern.permute.xlu1 %v1475_v21 }
 0x308   : > { %923 = vperm.xlu1 %1270, %v1668_v2  }
 0x30c   : > { %1272 = vset.pattern.permute.xlu1 %v1469_v15  ;;  %v905_v15 = vpop.permute.xlu0 %904 }
 0x30d   : > { %688 = vperm.xlu1 %1272, %v1673_v3   ;;  %v907_v18 = vmul.f32 %v905_v15, %v1673_v3  ;;  %v914_v19 = vmul.f32 %v905_v15, %v1668_v2 }
 0x310   : > { %v836_v27 = vpop.permute.xlu0 %835 }
 0x311   : > { %1273 = vset.pattern.permute.xlu1 %v1476_v24  ;;  %v838_v34 = vmul.f32 %v836_v27, %v1668_v2 }
 0x312   : > { %771 = vperm.xlu1 %1273, %v1668_v2  }
 0x316   : > { %1275 = vset.pattern.permute.xlu1 %v1479_v35  ;;  %v851_v35 = vmul.f32 %v836_v27, %v1673_v3 }
 0x317   : > { %859 = vperm.xlu1 %1275, %v1668_v2  }
 0x31b   : > { %864 = vperm.xlu1 %1275, %v1673_v3  }
 0x33e   : > { %v671_v36 = vpop.permute.xlu1 %670 }
 0x33f   : > { %673 = vst.msk [vmem:[%s1714_s17 + $0x20] sm:$0xff] %vm320_vm3, %v671_v36 }
 0x342   : > { %v679_v37 = vpop.permute.xlu1 %678 }
 0x343   : > { %681 = vst.msk [vmem:[%s1718_s20 + $0x20] sm:$0xff] %vm320_vm3, %v679_v37 }
 0x353   : > { %v700_v39 = vpop.permute.xlu1 %699 }
 0x354   : > { %v702_v42 = vmul.f32 %v700_v39, %v1668_v2  ;;  %v715_v43 = vmul.f32 %v700_v39, %v1673_v3 }
 0x357   : > { %v705_v40 = vpop.permute.xlu1 %704 }
 0x358   : > { %v707_v44 = vmul.f32 %v705_v40, %v1673_v3  ;;  %v714_v45 = vmul.f32 %v705_v40, %v1668_v2  ;;  %v929_v40 = vpop.permute.xlu0 %928 }
 0x35a   : > { %v708_v46 = vadd.f32 %v707_v44, %v702_v42  ;;  %v716_v47 = vsub.f32 %v714_v45, %v715_v43  ;;  %v931_v43 = vmul.f32 %v929_v40, %v1673_v3  ;;  %v938_v44 = vmul.f32 %v929_v40, %v1668_v2 }
 0x35c   : > { %718 = vrot.lane.b32.xlu1 %v716_v47, %s1462_s4  ;;  %710 = vrot.lane.b32.xlu0 %v708_v46, %s1462_s4  ;;  %v793_v50 = vpop.permute.xlu1 %792 }
 0x35d   : > { %v795_v51 = vmul.f32 %v793_v50, %v1673_v3  ;;  %v802_v52 = vmul.f32 %v793_v50, %v1668_v2 }
 0x35f   : > { %v796_v54 = vadd.f32 %v795_v51, %v790_v48  ;;  %v804_v55 = vsub.f32 %v802_v52, %v803_v49  ;;  %v1277_v51 = vld [vmem:[%s1654_s8] sm:$0xff]  ;;  %s947_s8 = scalar_lea.sflag [#allocation4], %s1650_s11 }
 0x360   : > { %v686_v52 = vmul.f32 %v1277_v51, %v1932_v38 }
 0x361   : > { %806 = vrot.lane.b32.xlu1 %v804_v55, %s1462_s4  ;;  %798 = vrot.lane.b32.xlu0 %v796_v54, %s1462_s4  ;;  %v876_v58 = vpop.permute.xlu1 %875  ;;  %v695_v54 = vmul.f32 %v1278_v53, %v1932_v38 }
 0x362   : > { %v878_v59 = vmul.f32 %v876_v58, %v1668_v2  ;;  %v891_v60 = vmul.f32 %v876_v58, %v1673_v3 }
 0x364   : > { %v884_v61 = vadd.f32 %v883_v56, %v878_v59  ;;  %v892_v62 = vsub.f32 %v890_v57, %v891_v60  ;;  %v777_v57 = vpop.permute.xlu0 %776 }
 0x365   : > { %v779_v58 = vmul.f32 %v1278_v53, %v777_v57  ;;  %v782_v59 = vmul.f32 %v1277_v51, %v777_v57 }
 0x366   : > { %894 = vrot.lane.b32.xlu1 %v892_v62, %s1462_s4  ;;  %886 = vrot.lane.b32.xlu0 %v884_v61, %s1462_s4  ;;  %v724_v63 = vpop.permute.xlu1 %723  ;;  %s1345_s4 = scalar_lea.vmem %s1344_s23, 2048 }
 0x367   : > { %v726_v4 = vmul.f32 %v724_v63, %v1668_v2  ;;  %v739_v5 = vmul.f32 %v724_v63, %v1673_v3  ;;  %p1347_p9 = scmp.lt.s32.totalorder %s1345_s4, %s1339_s7 }
 0x369   : > { %p1348_p0 = por %p1347_p9, %p1346_p8 }
 0x36a   : > { %v729_v0 = vpop.permute.xlu1 %728 }
 0x36b   : > { %v731_v6 = vmul.f32 %v729_v0, %v1673_v3  ;;  %v738_v7 = vmul.f32 %v729_v0, %v1668_v2  ;;  %p1349_p1 = pnand %p1348_p0, %p1342_p5 }
 0x36d   : > { %v732_v8 = vadd.f32 %v731_v6, %v726_v4  ;;  %v740_v9 = vsub.f32 %v738_v7, %v739_v5 }
 0x36f   : > { %742 = vrot.lane.b32.xlu1 %v740_v9, %s1463_s22  ;;  %734 = vrot.lane.b32.xlu0 %v732_v8, %s1463_s22  ;;  %v817_v12 = vpop.permute.xlu1 %816 }
 0x370   : > { %v819_v13 = vmul.f32 %v817_v12, %v1673_v3  ;;  %v826_v14 = vmul.f32 %v817_v12, %v1668_v2 }
 0x372   : > { %v820_v16 = vadd.f32 %v819_v13, %v814_v10  ;;  %v828_v17 = vsub.f32 %v826_v14, %v827_v11 }
 0x374   : > { %830 = vrot.lane.b32.xlu1 %v828_v17, %s1463_s22  ;;  %822 = vrot.lane.b32.xlu0 %v820_v16, %s1463_s22  ;;  %v900_v20 = vpop.permute.xlu1 %899 }
 0x375   : > { %v902_v21 = vmul.f32 %v900_v20, %v1668_v2  ;;  %v915_v22 = vmul.f32 %v900_v20, %v1673_v3 }
 0x377   : > { %v908_v23 = vadd.f32 %v907_v18, %v902_v21  ;;  %v916_v24 = vsub.f32 %v914_v19, %v915_v22 }
 0x379   : > { %918 = vrot.lane.b32.xlu1 %v916_v24, %s1463_s22  ;;  %910 = vrot.lane.b32.xlu0 %v908_v23, %s1463_s22  ;;  %v748_v25 = vpop.permute.xlu1 %747 }
 0x37a   : > { %v750_v28 = vmul.f32 %v748_v25, %v1668_v2  ;;  %v763_v29 = vmul.f32 %v748_v25, %v1673_v3 }
 0x37d   : > { %v753_v26 = vpop.permute.xlu1 %752 }
 0x37e   : > { %v755_v30 = vmul.f32 %v753_v26, %v1673_v3  ;;  %v762_v31 = vmul.f32 %v753_v26, %v1668_v2 }
 0x380   : > { %v756_v32 = vadd.f32 %v755_v30, %v750_v28  ;;  %v764_v33 = vsub.f32 %v762_v31, %v763_v29 }
 0x382   : > { %766 = vrot.lane.b32.xlu1 %v764_v33, %s1464_s27  ;;  %758 = vrot.lane.b32.xlu0 %v756_v32, %s1464_s27  ;;  %v841_v36 = vpop.permute.xlu1 %840 }
 0x383   : > { %v843_v37 = vmul.f32 %v841_v36, %v1673_v3  ;;  %v850_v39 = vmul.f32 %v841_v36, %v1668_v2 }
 0x385   : > { %v844_v41 = vadd.f32 %v843_v37, %v838_v34  ;;  %v852_v42 = vsub.f32 %v850_v39, %v851_v35 }
 0x387   : > { %854 = vrot.lane.b32.xlu1 %v852_v42, %s1464_s27  ;;  %846 = vrot.lane.b32.xlu0 %v844_v41, %s1464_s27  ;;  %v924_v45 = vpop.permute.xlu1 %923 }
 0x388   : > { %v926_v46 = vmul.f32 %v924_v45, %v1668_v2  ;;  %v939_v47 = vmul.f32 %v924_v45, %v1673_v3 }
 0x38a   : > { %v932_v48 = vadd.f32 %v931_v43, %v926_v46  ;;  %v940_v49 = vsub.f32 %v938_v44, %v939_v47 }
 0x38c   : > { %942 = vrot.lane.b32.xlu1 %v940_v49, %s1464_s27  ;;  %934 = vrot.lane.b32.xlu0 %v932_v48, %s1464_s27  ;;  %v689_v50 = vpop.permute.xlu1 %688 }
 0x38d   : > { %v691_v55 = vmul.f32 %v1278_v53, %v689_v50  ;;  %v694_v2 = vmul.f32 %v1277_v51, %v689_v50 }
 0x38f   : > { %v692_v3 = vadd.f32 %v691_v55, %v686_v52  ;;  %v696_v56 = vsub.f32 %v694_v2, %v695_v54 }
 0x391   : > { %693 = vst.msk [vmem:[%s1714_s17 + $0x28] sm:$0xff] %vm249_vm0, %v692_v3  ;;  %697 = vst.msk [vmem:[%s1718_s20 + $0x28] sm:$0xff] %vm249_vm0, %v696_v56  ;;  %v772_v60 = vpop.permute.xlu1 %771 }
 0x392   : > { %v774_v61 = vmul.f32 %v1277_v51, %v772_v60  ;;  %v783_v62 = vmul.f32 %v1278_v53, %v772_v60 }
 0x394   : > { %v780_v63 = vadd.f32 %v779_v58, %v774_v61  ;;  %v784_v38 = vsub.f32 %v782_v59, %v783_v62 }
 0x396   : > { %v860_v0 = vpop.permute.xlu1 %859  ;;  %781 = vst.msk [vmem:[%s1714_s17 + $0x30] sm:$0xff] %vm249_vm0, %v780_v63  ;;  %785 = vst.msk [vmem:[%s1718_s20 + $0x30] sm:$0xff] %vm249_vm0, %v784_v38 }
 0x397   : > { %v862_v1 = vmul.f32 %v1277_v51, %v860_v0  ;;  %v871_v4 = vmul.f32 %v1278_v53, %v860_v0 }
 0x39a   : > { %v865_v5 = vpop.permute.xlu1 %864 }
 0x39b   : > { %v867_v6 = vmul.f32 %v1278_v53, %v865_v5  ;;  %v870_v7 = vmul.f32 %v1277_v51, %v865_v5 }
 0x39d   : > { %v868_v8 = vadd.f32 %v867_v6, %v862_v1  ;;  %v872_v9 = vsub.f32 %v870_v7, %v871_v4 }
 0x39f   : > { %869 = vst.msk [vmem:[%s1714_s17 + $0x38] sm:$0xff] %vm249_vm0, %v868_v8  ;;  %873 = vst.msk [vmem:[%s1718_s20 + $0x38] sm:$0xff] %vm249_vm0, %v872_v9 }
 0x3ce   : > { %v711_v10 = vpop.permute.xlu0 %710  ;;  %v719_v11 = vpop.permute.xlu1 %718 }
 0x3cf   : > { %713 = vst.msk [vmem:[%s1714_s17 + $0x28] sm:$0xff] %vm270_vm1, %v711_v10  ;;  %721 = vst.msk [vmem:[%s1718_s20 + $0x28] sm:$0xff] %vm270_vm1, %v719_v11 }
 0x3d3   : > { %v799_v12 = vpop.permute.xlu0 %798  ;;  %v807_v13 = vpop.permute.xlu1 %806 }
 0x3d4   : > { %801 = vst.msk [vmem:[%s1714_s17 + $0x30] sm:$0xff] %vm270_vm1, %v799_v12  ;;  %809 = vst.msk [vmem:[%s1718_s20 + $0x30] sm:$0xff] %vm270_vm1, %v807_v13 }
 0x3d8   : > { %v887_v14 = vpop.permute.xlu0 %886  ;;  %v895_v15 = vpop.permute.xlu1 %894 }
 0x3d9   : > { %889 = vst.msk [vmem:[%s1714_s17 + $0x38] sm:$0xff] %vm270_vm1, %v887_v14  ;;  %897 = vst.msk [vmem:[%s1718_s20 + $0x38] sm:$0xff] %vm270_vm1, %v895_v15 }
 0x3e1   : > { %v735_v16 = vpop.permute.xlu0 %734  ;;  %v743_v17 = vpop.permute.xlu1 %742 }
 0x3e2   : > { %737 = vst.msk [vmem:[%s1714_s17 + $0x28] sm:$0xff] %vm295_vm2, %v735_v16  ;;  %745 = vst.msk [vmem:[%s1718_s20 + $0x28] sm:$0xff] %vm295_vm2, %v743_v17 }
 0x3e6   : > { %v823_v18 = vpop.permute.xlu0 %822  ;;  %v831_v19 = vpop.permute.xlu1 %830 }
 0x3e7   : > { %825 = vst.msk [vmem:[%s1714_s17 + $0x30] sm:$0xff] %vm295_vm2, %v823_v18  ;;  %833 = vst.msk [vmem:[%s1718_s20 + $0x30] sm:$0xff] %vm295_vm2, %v831_v19 }
 0x3eb   : > { %v911_v20 = vpop.permute.xlu0 %910  ;;  %v919_v21 = vpop.permute.xlu1 %918 }
 0x3ec   : > { %913 = vst.msk [vmem:[%s1714_s17 + $0x38] sm:$0xff] %vm295_vm2, %v911_v20  ;;  %921 = vst.msk [vmem:[%s1718_s20 + $0x38] sm:$0xff] %vm295_vm2, %v919_v21 }
 0x3f4   : > { %v759_v22 = vpop.permute.xlu0 %758  ;;  %v767_v23 = vpop.permute.xlu1 %766 }
 0x3f5   : > { %761 = vst.msk [vmem:[%s1714_s17 + $0x28] sm:$0xff] %vm320_vm3, %v759_v22  ;;  %769 = vst.msk [vmem:[%s1718_s20 + $0x28] sm:$0xff] %vm320_vm3, %v767_v23 }
 0x3f9   : > { %v847_v24 = vpop.permute.xlu0 %846  ;;  %v855_v25 = vpop.permute.xlu1 %854 }
 0x3fa   : > { %849 = vst.msk [vmem:[%s1714_s17 + $0x30] sm:$0xff] %vm320_vm3, %v847_v24  ;;  %857 = vst.msk [vmem:[%s1718_s20 + $0x30] sm:$0xff] %vm320_vm3, %v855_v25 }
 0x3fe   : > { %v935_v26 = vpop.permute.xlu0 %934  ;;  %v943_v27 = vpop.permute.xlu1 %942 }
 0x3ff   : > { %937 = vst.msk [vmem:[%s1714_s17 + $0x38] sm:$0xff] %vm320_vm3, %v935_v26  ;;  %945 = vst.msk [vmem:[%s1718_s20 + $0x38] sm:$0xff] %vm320_vm3, %v943_v27 }
 0x400   : > { %1352 = shalt.err (!%p1349_p1)
}
 0x401   : > { %s1353_s17 = scalar_lea.hbm %s2042_s10, 1024  ;;  %s1357_s27 = scalar_lea.hbm %s2121_s2, 2048 }
 0x402   : > { %p1354_p11 = scmp.ne.s32.totalorder %s2042_s10, %s1353_s17  ;;  %p1358_p4 = scmp.lt.u32.totalorder %s2042_s10, %s2121_s2 }
 0x403   : > { %p1359_p10 = scmp.lt.u32.totalorder %s1357_s27, %s1353_s17  ;;  %p1361_p13 = scmp.lt.u32.totalorder %s1353_s17, %s2042_s10 }
 0x404   : > { %p1355_p12 = pnand %p1354_p11, %p2135_p3 }
 0x405   : > { %p1360_p6 = por %p1359_p10, %p1358_p4 }
 0x406   : > { %p1356_p2 = pneg %p1355_p12 }
 0x407   : > { %p1362_p7 = por %p1361_p13, %p1360_p6 }
 0x409   : > { %p1363_p5 = pnand %p1362_p7, %p1356_p2 }
 0x40b   : > { %1366 = shalt.err (!%p1363_p5)
}
 0x40c   : > { %1131 = dma.vmem_to_hbm [thread:$0]  (%p2135_p3), %s2044_s30, 1024, %s2042_s10, %s947_s8  }
 0x40d   : > { %s952_s5 = scalar_lea.sflag [#allocation9], %s1650_s11  ;;  %s1367_s16 = scalar_lea.vmem %s2051_s26, 1024 }
 0x40e   : > { %p1368_p8 = scmp.ne.s32.totalorder %s2051_s26, %s1367_s16  ;;  %s1481_s19 = smov [#allocation8]  }
 0x40f   : > { %s1371_s7 = sshll.u32 %s1481_s19, 4  ;;  %s1372_s7 = int_to_ptr.vmem [resolvable:$false] %s1371_s7 }
 0x410   : > { %p1369_p9 = pnand %p1368_p8, %p2135_p3  ;;  %s1373_s9 = scalar_lea.vmem %s1372_s7, 2048 }
 0x411   : > { %p1374_p1 = scmp.lt.s32.totalorder %s2051_s26, %s1372_s7  ;;  %p1375_p11 = scmp.lt.s32.totalorder %s1373_s9, %s1367_s16 }
 0x412   : > { %p1370_p0 = pneg %p1369_p9 }
 0x413   : > { %p1376_p12 = por %p1375_p11, %p1374_p1 }
 0x415   : > { %p1377_p2 = pnand %p1376_p12, %p1370_p0 }
 0x417   : > { %1380 = shalt.err (!%p1377_p2)
}
 0x418   : > { %s1381_s11 = scalar_lea.hbm %s2049_s6, 1024  ;;  %s1385_s8 = scalar_lea.hbm %s2122_s3, 2048 }
 0x419   : > { %p1382_p4 = scmp.ne.s32.totalorder %s2049_s6, %s1381_s11  ;;  %p1386_p13 = scmp.lt.u32.totalorder %s2049_s6, %s2122_s3 }
 0x41a   : > { %p1387_p7 = scmp.lt.u32.totalorder %s1385_s8, %s1381_s11  ;;  %p1389_p8 = scmp.lt.u32.totalorder %s1381_s11, %s2049_s6 }
 0x41b   : > { %p1383_p10 = pnand %p1382_p4, %p2135_p3 }
 0x41c   : > { %p1388_p5 = por %p1387_p7, %p1386_p13 }
 0x41d   : > { %p1384_p6 = pneg %p1383_p10 }
 0x41e   : > { %p1390_p9 = por %p1389_p8, %p1388_p5 }
 0x420   : > { %p1391_p0 = pnand %p1390_p9, %p1384_p6 }
 0x422   : > { %1394 = shalt.err (!%p1391_p0)
}
 0x423   : > { %1132 = dma.vmem_to_hbm [thread:$0]  (%p2135_p3), %s2051_s26, 1024, %s2049_s6, %s952_s5  }
 0x424 PF: > { %s992_s17 = sand.u32 1, %s1429_s12   ;;  %p2136_p1 = scmp.ne.s32.totalorder %s2128_s25, 0 }
 0x425   : > { %p2137_p11 = scmp.ge.s32.totalorder %s1441_s15, 2  ;;  %s993_s20 = scalar_lea.sflag [#allocation4], %s992_s17 }
 0x427   : > { %p1143_p12 = pnand %p2137_p11, %p2136_p1 }
 0x429   : > { %1420 = dma.done.wait (!%p1143_p12), %s993_s20, 1024  }
 0x42a   : > { %1422 = vsyncadd (!%p1143_p12), %s993_s20, 4294966272  ;;  %s1002_s22 = scalar_lea.sflag [#allocation9], %s992_s17 }
 0x42b   : > { %1424 = dma.done.wait (!%p1143_p12), %s1002_s22, 1024  }
 0x42c   : > { %1426 = vsyncadd (!%p1143_p12), %s1002_s22, 4294966272  ;;  %p23_p3 = scmp.ge.s32.totalorder %s1527_s18, 4   ;;  %s2138_s12 = smov %s1433_s13 }
 0x42d   : > { %s2139_s13 = smov %s1437_s14  ;;  %s2140_s14 = smov %s1539_s21 }
 0x42e   : > { %s2141_s15 = smov %s1527_s18  ;;  %25 = sbr.rel (!%p23_p3) target bundleno = 9 (0x9), region = 103 }
 0x435   :  { %1007 = vsyncpa [#allocation3], 1 }
 0x436   :  { %1009 = vsyncpa [#allocation3 + $0x1], 1 }
 0x437   :  { %1010 = vsyncpa [#allocation6], 1 }
 0x438   :  { %1012 = vsyncpa [#allocation6 + $0x1], 1 }
 0x439   :  { %1013 = vsyncpa [#allocation4], 1 }
 0x43a   :  { %1015 = vsyncpa [#allocation4 + $0x1], 1 }
 0x43b   :  { %1016 = vsyncpa [#allocation9], 1 }
 0x43c   :  { %1018 = vsyncpa [#allocation9 + $0x1], 1 }

</bundles_post_ra>
